<compile_context>
chip_gen: v7x
topology: tpu7x:2x2x1
jax: 0.10.0
libtpu: 0.0.40
codegen_flags: <defaults>
</compile_context>

<pallas_src>
import jax
import jax.numpy as jnp
from jax.experimental import pallas as pl
from jax.experimental.pallas import tpu as pltpu

LANE = 128
SUBLANE_BF16 = 16           # bf16 LHS packs 16 rows per vreg sublane group
DIMS = [784, 512, 256, 128, 64, 10]


def _round_up(n, m):
    return (n + m - 1) // m * m


# ------------------------------ kernel ---------------------------------------


def _dnn_fused_kernel(x_ref, *refs):
    """refs = (w1, b1, w2, b2, ..., w5, b5, o_ref).  All 5 layers fused."""
    o_ref = refs[-1]
    wb = refs[:-1]
    n_layers = len(wb) // 2

    h = x_ref[...]                       # (bm, 784) f32
    for i in range(n_layers):
        w_ref = wb[2 * i]                # (K[_pad], N_pad) bf16, VMEM-resident
        b_ref = wb[2 * i + 1]            # (1, N_pad) f32
        y = jnp.dot(
            h.astype(w_ref.dtype),
            w_ref[...],
            preferred_element_type=jnp.float32,
        )
        y = y + b_ref[...]               # f32 bias add (broadcast over batch)
        if i < n_layers - 1:
            y = jnp.maximum(y, 0.0)      # ReLU on layers 1..4 only
        h = y
    o_ref[...] = h.astype(o_ref.dtype)


# ------------------------------ wrapper ---------------------------------------


def dnn_fused_call(x, packed_params):
    """x: (B_pad, 784) f32, B_pad a multiple of 16.
    Returns (B_pad, 128) f32 (last layer lane-padded)."""
    b_pad, k_in = x.shape
    out_pad = packed_params[-1][0].shape[1]   # 128

    bm = min(b_pad, 256)                      # 256 rows matches v6e/v7x MXU
    grid = (pl.cdiv(b_pad, bm),)

    in_specs = [pl.BlockSpec((bm, k_in), lambda i: (i, 0))]
    flat_args = []
    flops = 0
    bytes_accessed = x.size * x.dtype.itemsize + b_pad * out_pad * 4
    for w, b in packed_params:
        # Full-array blocks, constant index map -> weights stay in VMEM and
        # are not re-fetched across grid steps.
        in_specs.append(pl.BlockSpec(w.shape, lambda i: (0, 0)))
        in_specs.append(pl.BlockSpec(b.shape, lambda i: (0, 0)))
        flat_args.append(w)
        flat_args.append(b)
        flops += 2 * b_pad * w.shape[0] * w.shape[1]
        bytes_accessed += w.size * w.dtype.itemsize + b.size * b.dtype.itemsize

    out_spec = pl.BlockSpec((bm, out_pad), lambda i: (i, 0))

    # Only shard the batch axis across TensorCores once there is enough work
    # per core to hide a duplicated weight fetch (review: v7x megacore).
    semantics = ("parallel",) if grid[0] >= 8 else ("arbitrary",)

    return pl.pallas_call(
        _dnn_fused_kernel,
        out_shape=jax.ShapeDtypeStruct((b_pad, out_pad), jnp.float32),
        grid_spec=pltpu.PrefetchScalarGridSpec(
            num_scalar_prefetch=0,
            grid=grid,
            in_specs=in_specs,
            out_specs=out_spec,
        ),
        compiler_params=pltpu.CompilerParams(
            dimension_semantics=semantics,
            vmem_limit_bytes=32 << 20,
        ),
        cost_estimate=pl.CostEstimate(
            flops=flops,
            transcendentals=0,
            bytes_accessed=bytes_accessed,
        ),
    )(x, *flat_args)


def dnn_forward(x, packed_params):
    # x.view(-1, 784) equivalent; pad batch rows to a multiple of 16 (sublane
    # dense bf16 LHS).  NO feature (K) padding -- kernel consumes 784 directly.
    h = x.reshape(-1, DIMS[0])
    batch = h.shape[0]
    b_pad = _round_up(max(batch, SUBLANE_BF16), SUBLANE_BF16)
    if b_pad != batch:
        h = jnp.pad(h, ((0, b_pad - batch), (0, 0)))
    out_padded = dnn_fused_call(h, packed_params)
    return out_padded[:batch, : DIMS[-1]]     # slice real rows / 10 logits


# ------------------------------ params ---------------------------------------


def init_params(key):
    """Deterministic init mimicking nn.Linear (uniform +-1/sqrt(fan_in)).

    Weights stored as (in_features, out_features) -- transpose of PyTorch's
    nn.Linear.weight -- so the kernel computes y = x @ W + b.
    """
    params = []
    for i in range(len(DIMS) - 1):
        fan_in, fan_out = DIMS[i], DIMS[i + 1]
        key, kw, kb = jax.random.split(key, 3)
        bound = 1.0 / jnp.sqrt(jnp.float32(fan_in))
        w = jax.random.uniform(
            kw, (fan_in, fan_out), jnp.float32, minval=-bound, maxval=bound
        )
        b = jax.random.uniform(
            kb, (fan_out,), jnp.float32, minval=-bound, maxval=bound
        )
        params.append((w, b))
    return params


def prepare_params(params):
    """Zero-pad narrow layers to 128-lane multiples and cast weights to bf16.

    Layer 1 keeps K = 784 (no K padding; block uses full array dim).  Output
    (N) dims are padded to 128; later layers' K dims are padded to match the
    previous layer's padded output.  Zero padding keeps the math exact: padded
    lanes carry exact zeros through bias (0) and ReLU.  Biases stay f32.
    """
    packed = []
    for i, (w, b) in enumerate(params):
        k, n = w.shape
        k_pad = k if i == 0 else _round_up(k, LANE)
        n_pad = _round_up(n, LANE)
        wp = jnp.zeros((k_pad, n_pad), jnp.float32).at[:k, :n].set(w)
        bp = jnp.zeros((1, n_pad), jnp.float32).at[0, :n].set(b)
        packed.append((wp.astype(jnp.bfloat16), bp))
    return packed


# ------------------------------ reference ------------------------------------


def dnn_reference(x, params):
    """Pure-JAX reference with the same numerics as the kernel
    (bf16 matmul inputs, f32 accumulation, f32 bias/ReLU)."""
    h = x.reshape(-1, DIMS[0])
    n_layers = len(params)
    for i, (w, b) in enumerate(params):
        y = jnp.dot(
            h.astype(jnp.bfloat16),
            w.astype(jnp.bfloat16),
            preferred_element_type=jnp.float32,
        ) + b
        if i < n_layers - 1:
            y = jnp.maximum(y, 0.0)
        h = y
    return h


# ------------------------------ main ------------------------------------------

if __name__ == "__main__":
    key = jax.random.PRNGKey(0)
    key, kx = jax.random.split(key)
    # MNIST-style input: (B, 1, 28, 28) -> flattened to (B, 784) inside forward.
    x = jax.random.normal(kx, (8, 1, 28, 28), jnp.float32)

    params = init_params(key)
    packed = prepare_params(params)

    out = jax.block_until_ready(dnn_forward(x, packed))
    ref = dnn_reference(x, params)

    assert out.shape == (8, 10), out.shape
    assert jnp.allclose(out, ref, atol=1e-2, rtol=1e-2), (
        float(jnp.max(jnp.abs(out - ref)))
    )
    print("KERNEL_OK")
</pallas_src>

<mosaic_0001>
module attributes {stable_mosaic.version = 11 : i64} {
  func.func @_dnn_fused_kernel(%arg0: i32, %arg1: memref<16x784xf32, #tpu.memory_space<vmem>>, %arg2: memref<784x512xbf16, #tpu.memory_space<vmem>>, %arg3: memref<1x512xf32, #tpu.memory_space<vmem>>, %arg4: memref<512x256xbf16, #tpu.memory_space<vmem>>, %arg5: memref<1x256xf32, #tpu.memory_space<vmem>>, %arg6: memref<256x128xbf16, #tpu.memory_space<vmem>>, %arg7: memref<1x128xf32, #tpu.memory_space<vmem>>, %arg8: memref<128x128xbf16, #tpu.memory_space<vmem>>, %arg9: memref<1x128xf32, #tpu.memory_space<vmem>>, %arg10: memref<128x128xbf16, #tpu.memory_space<vmem>>, %arg11: memref<1x128xf32, #tpu.memory_space<vmem>>, %arg12: memref<16x128xf32, #tpu.memory_space<vmem>>) attributes {dimension_semantics = [#tpu.dimension_semantics<arbitrary>], iteration_bounds = array<i64: 1>, scalar_prefetch = 0 : i64, scratch_operands = 0 : i64, tpu.core_type = #tpu.core_type<tc>, window_params = [{transform_indices = @transform_0, window_bounds = array<i64: 16, 784>}, {pipeline_mode = #tpu.pipeline_mode<synchronous>, transform_indices = @transform_1, window_bounds = array<i64: 784, 512>}, {pipeline_mode = #tpu.pipeline_mode<synchronous>, transform_indices = @transform_2, window_bounds = array<i64: 1, 512>}, {pipeline_mode = #tpu.pipeline_mode<synchronous>, transform_indices = @transform_3, window_bounds = array<i64: 512, 256>}, {pipeline_mode = #tpu.pipeline_mode<synchronous>, transform_indices = @transform_4, window_bounds = array<i64: 1, 256>}, {pipeline_mode = #tpu.pipeline_mode<synchronous>, transform_indices = @transform_5, window_bounds = array<i64: 256, 128>}, {pipeline_mode = #tpu.pipeline_mode<synchronous>, transform_indices = @transform_6, window_bounds = array<i64: 1, 128>}, {pipeline_mode = #tpu.pipeline_mode<synchronous>, transform_indices = @transform_7, window_bounds = array<i64: 128, 128>}, {pipeline_mode = #tpu.pipeline_mode<synchronous>, transform_indices = @transform_8, window_bounds = array<i64: 1, 128>}, {pipeline_mode = #tpu.pipeline_mode<synchronous>, transform_indices = @transform_9, window_bounds = array<i64: 128, 128>}, {pipeline_mode = #tpu.pipeline_mode<synchronous>, transform_indices = @transform_10, window_bounds = array<i64: 1, 128>}, {transform_indices = @transform_11, window_bounds = array<i64: 16, 128>}]} {
    %c0 = arith.constant 0 : index
    %c0_0 = arith.constant 0 : index
    %0 = vector.load %arg1[%c0, %c0_0] : memref<16x784xf32, #tpu.memory_space<vmem>>, vector<16x784xf32>
    %1 = arith.truncf %0 : vector<16x784xf32> to vector<16x784xbf16>
    %c0_1 = arith.constant 0 : index
    %c0_2 = arith.constant 0 : index
    %2 = vector.load %arg2[%c0_1, %c0_2] : memref<784x512xbf16, #tpu.memory_space<vmem>>, vector<784x512xbf16>
    %cst = arith.constant dense<0.000000e+00> : vector<16x512xf32>
    %3 = tpu.matmul %1, %2, %cst {dimension_numbers = #tpu.dot_dimension_numbers<[1], [0], [0], [1], [0, 0, 1, 1], [], []>} : vector<16x784xbf16>, vector<784x512xbf16>, vector<16x512xf32> -> vector<16x512xf32>
    %c0_3 = arith.constant 0 : index
    %c0_4 = arith.constant 0 : index
    %4 = vector.load %arg3[%c0_3, %c0_4] : memref<1x512xf32, #tpu.memory_space<vmem>>, vector<1x512xf32>
    %5 = vector.broadcast %4 : vector<1x512xf32> to vector<16x512xf32>
    %6 = arith.addf %3, %5 : vector<16x512xf32>
    %cst_5 = arith.constant 0.000000e+00 : f32
    %7 = vector.broadcast %cst_5 : f32 to vector<16x512xf32>
    %8 = arith.maximumf %6, %7 : vector<16x512xf32>
    %9 = arith.truncf %8 : vector<16x512xf32> to vector<16x512xbf16>
    %c0_6 = arith.constant 0 : index
    %c0_7 = arith.constant 0 : index
    %10 = vector.load %arg4[%c0_6, %c0_7] : memref<512x256xbf16, #tpu.memory_space<vmem>>, vector<512x256xbf16>
    %cst_8 = arith.constant dense<0.000000e+00> : vector<16x256xf32>
    %11 = tpu.matmul %9, %10, %cst_8 {dimension_numbers = #tpu.dot_dimension_numbers<[1], [0], [0], [1], [0, 0, 1, 1], [], []>} : vector<16x512xbf16>, vector<512x256xbf16>, vector<16x256xf32> -> vector<16x256xf32>
    %c0_9 = arith.constant 0 : index
    %c0_10 = arith.constant 0 : index
    %12 = vector.load %arg5[%c0_9, %c0_10] : memref<1x256xf32, #tpu.memory_space<vmem>>, vector<1x256xf32>
    %13 = vector.broadcast %12 : vector<1x256xf32> to vector<16x256xf32>
    %14 = arith.addf %11, %13 : vector<16x256xf32>
    %cst_11 = arith.constant 0.000000e+00 : f32
    %15 = vector.broadcast %cst_11 : f32 to vector<16x256xf32>
    %16 = arith.maximumf %14, %15 : vector<16x256xf32>
    %17 = arith.truncf %16 : vector<16x256xf32> to vector<16x256xbf16>
    %c0_12 = arith.constant 0 : index
    %c0_13 = arith.constant 0 : index
    %18 = vector.load %arg6[%c0_12, %c0_13] : memref<256x128xbf16, #tpu.memory_space<vmem>>, vector<256x128xbf16>
    %cst_14 = arith.constant dense<0.000000e+00> : vector<16x128xf32>
    %19 = tpu.matmul %17, %18, %cst_14 {dimension_numbers = #tpu.dot_dimension_numbers<[1], [0], [0], [1], [0, 0, 1, 1], [], []>} : vector<16x256xbf16>, vector<256x128xbf16>, vector<16x128xf32> -> vector<16x128xf32>
    %c0_15 = arith.constant 0 : index
    %c0_16 = arith.constant 0 : index
    %20 = vector.load %arg7[%c0_15, %c0_16] : memref<1x128xf32, #tpu.memory_space<vmem>>, vector<1x128xf32>
    %21 = vector.broadcast %20 : vector<1x128xf32> to vector<16x128xf32>
    %22 = arith.addf %19, %21 : vector<16x128xf32>
    %cst_17 = arith.constant 0.000000e+00 : f32
    %23 = vector.broadcast %cst_17 : f32 to vector<16x128xf32>
    %24 = arith.maximumf %22, %23 : vector<16x128xf32>
    %25 = arith.truncf %24 : vector<16x128xf32> to vector<16x128xbf16>
    %c0_18 = arith.constant 0 : index
    %c0_19 = arith.constant 0 : index
    %26 = vector.load %arg8[%c0_18, %c0_19] : memref<128x128xbf16, #tpu.memory_space<vmem>>, vector<128x128xbf16>
    %cst_20 = arith.constant dense<0.000000e+00> : vector<16x128xf32>
    %27 = tpu.matmul %25, %26, %cst_20 {dimension_numbers = #tpu.dot_dimension_numbers<[1], [0], [0], [1], [0, 0, 1, 1], [], []>} : vector<16x128xbf16>, vector<128x128xbf16>, vector<16x128xf32> -> vector<16x128xf32>
    %c0_21 = arith.constant 0 : index
    %c0_22 = arith.constant 0 : index
    %28 = vector.load %arg9[%c0_21, %c0_22] : memref<1x128xf32, #tpu.memory_space<vmem>>, vector<1x128xf32>
    %29 = vector.broadcast %28 : vector<1x128xf32> to vector<16x128xf32>
    %30 = arith.addf %27, %29 : vector<16x128xf32>
    %cst_23 = arith.constant 0.000000e+00 : f32
    %31 = vector.broadcast %cst_23 : f32 to vector<16x128xf32>
    %32 = arith.maximumf %30, %31 : vector<16x128xf32>
    %33 = arith.truncf %32 : vector<16x128xf32> to vector<16x128xbf16>
    %c0_24 = arith.constant 0 : index
    %c0_25 = arith.constant 0 : index
    %34 = vector.load %arg10[%c0_24, %c0_25] : memref<128x128xbf16, #tpu.memory_space<vmem>>, vector<128x128xbf16>
    %cst_26 = arith.constant dense<0.000000e+00> : vector<16x128xf32>
    %35 = tpu.matmul %33, %34, %cst_26 {dimension_numbers = #tpu.dot_dimension_numbers<[1], [0], [0], [1], [0, 0, 1, 1], [], []>} : vector<16x128xbf16>, vector<128x128xbf16>, vector<16x128xf32> -> vector<16x128xf32>
    %c0_27 = arith.constant 0 : index
    %c0_28 = arith.constant 0 : index
    %36 = vector.load %arg11[%c0_27, %c0_28] : memref<1x128xf32, #tpu.memory_space<vmem>>, vector<1x128xf32>
    %37 = vector.broadcast %36 : vector<1x128xf32> to vector<16x128xf32>
    %38 = arith.addf %35, %37 : vector<16x128xf32>
    %c0_29 = arith.constant 0 : index
    %c0_30 = arith.constant 0 : index
    %39 = vector.load %arg12[%c0_29, %c0_30] : memref<16x128xf32, #tpu.memory_space<vmem>>, vector<16x128xf32>
    tpu.vector_store %arg12[%c0_29, %c0_30], %38 {strides = array<i32>} : memref<16x128xf32, #tpu.memory_space<vmem>>, vector<16x128xf32>,
    return
  }
  func.func @transform_0(%arg0: i32) -> (i32, i32) {
    %c0_i32 = arith.constant 0 : i32
    %c0_i32_0 = arith.constant 0 : i32
    return %arg0, %c0_i32 : i32, i32
  }
  func.func @transform_1(%arg0: i32) -> (i32, i32) {
    %c0_i32 = arith.constant 0 : i32
    %c0_i32_0 = arith.constant 0 : i32
    %c0_i32_1 = arith.constant 0 : i32
    return %c0_i32, %c0_i32_0 : i32, i32
  }
  func.func @transform_2(%arg0: i32) -> (i32, i32) {
    %c0_i32 = arith.constant 0 : i32
    %c0_i32_0 = arith.constant 0 : i32
    %c0_i32_1 = arith.constant 0 : i32
    return %c0_i32, %c0_i32_0 : i32, i32
  }
  func.func @transform_3(%arg0: i32) -> (i32, i32) {
    %c0_i32 = arith.constant 0 : i32
    %c0_i32_0 = arith.constant 0 : i32
    %c0_i32_1 = arith.constant 0 : i32
    return %c0_i32, %c0_i32_0 : i32, i32
  }
  func.func @transform_4(%arg0: i32) -> (i32, i32) {
    %c0_i32 = arith.constant 0 : i32
    %c0_i32_0 = arith.constant 0 : i32
    %c0_i32_1 = arith.constant 0 : i32
    return %c0_i32, %c0_i32_0 : i32, i32
  }
  func.func @transform_5(%arg0: i32) -> (i32, i32) {
    %c0_i32 = arith.constant 0 : i32
    %c0_i32_0 = arith.constant 0 : i32
    %c0_i32_1 = arith.constant 0 : i32
    return %c0_i32, %c0_i32_0 : i32, i32
  }
  func.func @transform_6(%arg0: i32) -> (i32, i32) {
    %c0_i32 = arith.constant 0 : i32
    %c0_i32_0 = arith.constant 0 : i32
    %c0_i32_1 = arith.constant 0 : i32
    return %c0_i32, %c0_i32_0 : i32, i32
  }
  func.func @transform_7(%arg0: i32) -> (i32, i32) {
    %c0_i32 = arith.constant 0 : i32
    %c0_i32_0 = arith.constant 0 : i32
    %c0_i32_1 = arith.constant 0 : i32
    return %c0_i32, %c0_i32_0 : i32, i32
  }
  func.func @transform_8(%arg0: i32) -> (i32, i32) {
    %c0_i32 = arith.constant 0 : i32
    %c0_i32_0 = arith.constant 0 : i32
    %c0_i32_1 = arith.constant 0 : i32
    return %c0_i32, %c0_i32_0 : i32, i32
  }
  func.func @transform_9(%arg0: i32) -> (i32, i32) {
    %c0_i32 = arith.constant 0 : i32
    %c0_i32_0 = arith.constant 0 : i32
    %c0_i32_1 = arith.constant 0 : i32
    return %c0_i32, %c0_i32_0 : i32, i32
  }
  func.func @transform_10(%arg0: i32) -> (i32, i32) {
    %c0_i32 = arith.constant 0 : i32
    %c0_i32_0 = arith.constant 0 : i32
    %c0_i32_1 = arith.constant 0 : i32
    return %c0_i32, %c0_i32_0 : i32, i32
  }
  func.func @transform_11(%arg0: i32) -> (i32, i32) {
    %c0_i32 = arith.constant 0 : i32
    %c0_i32_0 = arith.constant 0 : i32
    return %arg0, %c0_i32 : i32, i32
  }
}

</mosaic_0001>

<bundles_post_ra>
// kernel: tpu_custom_call.1
= control target key start
LH: loop header
LB: loop body
LE: loop exit
PB: predicated region body
PF: predicated region fallthrough
CT: control target
= control target key end

     0   :  { %16 = vsyncpa [#allocation3], 0  ;;  %s3891_s0 = inlined_call_operand.hbm [shape: f32[16,784], index: 0, kind: input, shape index: {}]   ;;  %s3892_s1 = inlined_call_operand.hbm [shape: bf16[784,512], index: 1, kind: input, shape index: {}]   ;;  %s3893_s2 = inlined_call_operand.vmem [shape: f32[1,512], index: 2, kind: input, shape index: {}]   ;;  %s3894_s3 = inlined_call_operand.hbm [shape: bf16[512,256], index: 3, kind: input, shape index: {}]   ;;  %s3895_s4 = inlined_call_operand.vmem [shape: f32[1,256], index: 4, kind: input, shape index: {}]   ;;  %s3896_s5 = inlined_call_operand.hbm [shape: bf16[256,128], index: 5, kind: input, shape index: {}]   ;;  %s3897_s6 = inlined_call_operand.vmem [shape: f32[1,128], index: 6, kind: input, shape index: {}]   ;;  %s3898_s7 = inlined_call_operand.hbm [shape: bf16[128,128], index: 7, kind: input, shape index: {}]   ;;  %s3899_s8 = inlined_call_operand.vmem [shape: f32[1,128], index: 8, kind: input, shape index: {}]   ;;  %s3900_s9 = inlined_call_operand.hbm [shape: bf16[128,128], index: 9, kind: input, shape index: {}]   ;;  %s3901_s10 = inlined_call_operand.vmem [shape: f32[1,128], index: 10, kind: input, shape index: {}]   ;;  %s3902_s11 = inlined_call_operand.hbm [shape: f32[16,128], index: 11, kind: output, shape index: {}]  }
   0x1   :  { %17 = vsyncpa [#allocation6], 0 }
   0x2   :  { %18 = vsyncpa [#allocation9], 0 }
   0x3   :  { %19 = vsyncpa [#allocation12], 0 }
   0x4   :  { %20 = vsyncpa [#allocation4], 0  ;;  %s3638_s17 = smov [#allocation5]   ;;  %s3474_s21 = scalar_lea.hbm %s3892_s1, 25088 }
   0x5   :  { %s38_s18 = sshll.u32 %s3638_s17, 4  ;;  %p3475_p0 = scmp.ne.s32.totalorder %s3892_s1, %s3474_s21  ;;  %s39_s18 = int_to_ptr.vmem [resolvable:$true] %s38_s18 }
   0x6   :  { %p3478_p1 = scmp.lt.u32.totalorder %s3474_s21, %s3892_s1 }
   0x8   :  { %p3480_p2 = pnand %p3478_p1, %p3475_p0 }
   0xa   :  { %3483 = shalt.err (!%p3480_p2)
}
   0xb   :  { %s3484_s26 = scalar_lea.vmem %s39_s18, 25088  ;;  %p3489_p4 = scmp.lt.s32.totalorder %s39_s18, %s39_s18 }
   0xc   :  { %p3485_p3 = scmp.ne.s32.totalorder %s39_s18, %s3484_s26  ;;  %p3490_p5 = scmp.lt.s32.totalorder %s3484_s26, %s3484_s26 }
   0xe   :  { %p3491_p6 = por %p3490_p5, %p3489_p4 }
  0x10   :  { %p3492_p7 = pnand %p3491_p6, %p3485_p3 }
  0x12   :  { %3495 = shalt.err (!%p3492_p7)
}
  0x13   :  { %s3639_s27 = smov 256   ;;  %s3640_s28 = smov 16  }
  0x14   :  { %44 = dma.hbm_to_vmem [thread:$0]  %s3892_s1, 25088, %s39_s18, [#allocation6], %s3639_s27, %s3639_s27, %s3640_s28  }
  0x15   :  { %s3641_s12 = smov [#allocation8]   ;;  %s3496_s16 = scalar_lea.hbm %s3896_s5, 2048 }
  0x16   :  { %s66_s13 = sshll.u32 %s3641_s12, 4  ;;  %p3497_p8 = scmp.ne.s32.totalorder %s3896_s5, %s3496_s16  ;;  %s67_s13 = int_to_ptr.vmem [resolvable:$true] %s66_s13 }
  0x17   :  { %p3500_p9 = scmp.lt.u32.totalorder %s3496_s16, %s3896_s5 }
  0x19   :  { %p3502_p10 = pnand %p3500_p9, %p3497_p8 }
  0x1b   :  { %3505 = shalt.err (!%p3502_p10)
}
  0x1c   :  { %s3506_s22 = scalar_lea.vmem %s67_s13, 2048  ;;  %p3511_p12 = scmp.lt.s32.totalorder %s67_s13, %s67_s13 }
  0x1d   :  { %p3507_p11 = scmp.ne.s32.totalorder %s67_s13, %s3506_s22  ;;  %p3512_p13 = scmp.lt.s32.totalorder %s3506_s22, %s3506_s22 }
  0x1f   :  { %p3513_p0 = por %p3512_p13, %p3511_p12 }
  0x21   :  { %p3514_p1 = pnand %p3513_p0, %p3507_p11 }
  0x23   :  { %3517 = shalt.err (!%p3514_p1)
}
  0x24   :  { %s3642_s1 = smov 64   ;;  %s3643_s18 = smov 4  }
  0x25   :  { %72 = dma.hbm_to_vmem [thread:$0]  %s3896_s5, 2048, %s67_s13, [#allocation9], %s3642_s1, %s3642_s1, %s3643_s18  }
  0x26   :  { %s3644_s25 = smov [#allocation2]   ;;  %s3518_s29 = scalar_lea.hbm %s3891_s0, 1792 }
  0x27   :  { %s26_s26 = sshll.u32 %s3644_s25, 4  ;;  %p3519_p2 = scmp.ne.s32.totalorder %s3891_s0, %s3518_s29  ;;  %s27_s26 = int_to_ptr.vmem [resolvable:$true] %s26_s26 }
  0x28   :  { %p3522_p3 = scmp.lt.u32.totalorder %s3518_s29, %s3891_s0 }
  0x2a   :  { %p3524_p4 = pnand %p3522_p3, %p3519_p2 }
  0x2c   :  { %3527 = shalt.err (!%p3524_p4)
}
  0x2d   :  { %s3528_s16 = scalar_lea.vmem %s27_s26, 1792  ;;  %p3533_p6 = scmp.lt.s32.totalorder %s27_s26, %s27_s26 }
  0x2e   :  { %p3529_p5 = scmp.ne.s32.totalorder %s27_s26, %s3528_s16  ;;  %p3534_p7 = scmp.lt.s32.totalorder %s3528_s16, %s3528_s16 }
  0x30   :  { %p3535_p8 = por %p3534_p7, %p3533_p6 }
  0x32   :  { %p3536_p9 = pnand %p3535_p8, %p3529_p5 }
  0x34   :  { %3539 = shalt.err (!%p3536_p9)
}
  0x35   :  { %s3645_s5 = smov 896   ;;  %s3646_s13 = smov 56  }
  0x36   :  { %32 = dma.hbm_to_vmem [thread:$0]  %s3891_s0, 1792, %s27_s26, [#allocation3], %s3645_s5, %s3645_s5, %s3646_s13  }
  0x37   :  { %s3647_s20 = smov [#allocation7]   ;;  %s3540_s24 = scalar_lea.hbm %s3894_s3, 8192 }
  0x38   :  { %s52_s21 = sshll.u32 %s3647_s20, 4  ;;  %p3541_p10 = scmp.ne.s32.totalorder %s3894_s3, %s3540_s24  ;;  %s53_s21 = int_to_ptr.vmem [resolvable:$true] %s52_s21 }
  0x39   :  { %p3544_p11 = scmp.lt.u32.totalorder %s3540_s24, %s3894_s3 }
  0x3b   :  { %p3546_p12 = pnand %p3544_p11, %p3541_p10 }
  0x3d   :  { %3549 = shalt.err (!%p3546_p12)
}
  0x3e   :  { %s3550_s30 = scalar_lea.vmem %s53_s21, 8192  ;;  %p3555_p0 = scmp.lt.s32.totalorder %s53_s21, %s53_s21 }
  0x3f   :  { %p3551_p13 = scmp.ne.s32.totalorder %s53_s21, %s3550_s30  ;;  %p3556_p1 = scmp.lt.s32.totalorder %s3550_s30, %s3550_s30 }
  0x41   :  { %p3557_p2 = por %p3556_p1, %p3555_p0 }
  0x43   :  { %p3558_p3 = pnand %p3557_p2, %p3551_p13 }
  0x45   :  { %3561 = shalt.err (!%p3558_p3)
}
  0x46   :  { %s3648_s0 = smov 128   ;;  %s3649_s26 = smov 8  }
  0x47   :  { %58 = dma.hbm_to_vmem [thread:$0]  %s3894_s3, 8192, %s53_s21, [#allocation6], %s3648_s0, %s3648_s0, %s3649_s26  }
  0x48   :  { %s3650_s15 = smov [#allocation10]   ;;  %s3651_s5 = smov [#allocation11]  }
  0x49   :  { %s80_s16 = sshll.u32 %s3650_s15, 4  ;;  %s94_s13 = sshll.u32 %s3651_s5, 4  ;;  %s81_s16 = int_to_ptr.vmem [resolvable:$true] %s80_s16  ;;  %s3770_s13 = int_to_ptr.vmem [resolvable:$true] %s94_s13 }
  0x4a   :  { %s3562_s20 = scalar_lea.hbm %s3898_s7, 1024 }
  0x4b   :  { %p3563_p4 = scmp.ne.s32.totalorder %s3898_s7, %s3562_s20  ;;  %p3566_p5 = scmp.lt.u32.totalorder %s3562_s20, %s3898_s7 }
  0x4d   :  { %p3568_p6 = pnand %p3566_p5, %p3563_p4 }
  0x4f   :  { %3571 = shalt.err (!%p3568_p6)
}
  0x50   :  { %s3572_s3 = scalar_lea.vmem %s81_s16, 1024  ;;  %p3577_p8 = scmp.lt.s32.totalorder %s81_s16, %s81_s16 }
  0x51   :  { %p3573_p7 = scmp.ne.s32.totalorder %s81_s16, %s3572_s3  ;;  %p3578_p9 = scmp.lt.s32.totalorder %s3572_s3, %s3572_s3 }
  0x53   :  { %p3579_p10 = por %p3578_p9, %p3577_p8 }
  0x55   :  { %p3580_p11 = pnand %p3579_p10, %p3573_p7 }
  0x57   :  { %3583 = shalt.err (!%p3580_p11)
}
  0x58   :  { %86 = dma.hbm_to_vmem [thread:$0]  %s3898_s7, 1024, %s81_s16, [#allocation9], %s3642_s1, %s3642_s1, %s3643_s18  }
  0x59   :  { %s3584_s30 = scalar_lea.hbm %s3900_s9, 1024 }
  0x5a   :  { %p3585_p12 = scmp.ne.s32.totalorder %s3900_s9, %s3584_s30  ;;  %p3588_p13 = scmp.lt.u32.totalorder %s3584_s30, %s3900_s9 }
  0x5c   :  { %p3590_p0 = pnand %p3588_p13, %p3585_p12 }
  0x5e   :  { %3593 = shalt.err (!%p3590_p0)
}
  0x5f   :  { %s3594_s17 = scalar_lea.vmem %s3770_s13, 1024  ;;  %p3599_p2 = scmp.lt.s32.totalorder %s3770_s13, %s3770_s13 }
  0x60   :  { %p3595_p1 = scmp.ne.s32.totalorder %s3770_s13, %s3594_s17  ;;  %p3600_p3 = scmp.lt.s32.totalorder %s3594_s17, %s3594_s17 }
  0x62   :  { %p3601_p4 = por %p3600_p3, %p3599_p2 }
  0x64   :  { %p3602_p5 = pnand %p3601_p4, %p3595_p1 }
  0x66   :  { %3605 = shalt.err (!%p3602_p5)
}
  0x67   :  { %100 = dma.hbm_to_vmem [thread:$0]  %s3900_s9, 1024, %s3770_s13, [#allocation12], %s3642_s1, %s3642_s1, %s3643_s18  }
  0x68   :  { %3628 = dma.done.wait [#allocation3], 1792  }
  0x69   :  { %3629 = vsyncadd [#allocation3], 4294965504 }
  0x6a   :  { %3630 = dma.done.wait [#allocation6], 33280  }
  0x6b   :  { %3631 = vsyncadd [#allocation6], 4294934016 }
  0x6c   :  { %3632 = dma.done.wait [#allocation9], 3072  }
  0x6d   :  { %3633 = vsyncadd [#allocation9], 4294964224 }
  0x6e   :  { %3634 = dma.done.wait [#allocation12], 1024  }
  0x6f   :  { %3635 = vsyncadd [#allocation12], 4294966272  ;;  %v3652_v0 = vmov 0   ;;  %v3052_v1 = vld [vmem:[#allocation5 + $0x4] ss:$16 sps:$4 sm:$0xff]   ;;  %v135_v10 = vld [vmem:[#allocation2 + $0x68] sm:$0xff] }
  0x70   :  { %1506 = vmatprep.mubr.bf16.mxu1 %v3652_v0  ;;  %v3054_v2 = vld [vmem:[#allocation5 + $0x604] ss:$16 sps:$4 sm:$0xff]   ;;  %1345 = vmatprep.subr.bf16.mxu0 %v3052_v1  ;;  %v3056_v3 = vld [vmem:[#allocation5] ss:$16 sps:$4 sm:$0xff]   ;;  %v3060_v6 = vld [vmem:[#allocation5 + $0x8] ss:$16 sps:$4 sm:$0xff]  }
  0x71   :  { %v3057_v4 = vld [vmem:[#allocation5 + $0x600] ss:$16 sps:$4 sm:$0xff]   ;;  %1474 = vmatprep.subr.bf16.mxu1 %v3054_v2  ;;  %v3058_v5 = vld [vmem:[#allocation5 + $0x24] ss:$16 sps:$4 sm:$0xff]   ;;  %1346 = vmatpush1.bf16.msra.mxu0 %v3056_v3  ;;  %v3062_v7 = vld [vmem:[#allocation5 + $0xc] ss:$16 sps:$4 sm:$0xff]  }
  0x72   :  { %1475 = vmatpush1.bf16.msra.mxu1 %v3057_v4  ;;  %1347 = vmatprep.subr.bf16.mxu0 %v3058_v5  ;;  %v3063_v8 = vld [vmem:[#allocation5 + $0x20] ss:$16 sps:$4 sm:$0xff]   ;;  %vm1341_vm0 = vcmask 130048   ;;  %v3064_v12 = vld [vmem:[#allocation5 + $0x44] ss:$16 sps:$4 sm:$0xff]   ;;  %v123_v51 = vld [vmem:[#allocation2 + $0x8] sm:$0xff] }
  0x73   :  { %v128_v9 = vld [vmem:[#allocation2 + $0x30] sm:$0xff]  ;;  %1517 = vmatprep.subr.bf16.mxu1 %v3062_v7  ;;  %v3066_v13 = vld [vmem:[#allocation5 + $0x28] ss:$16 sps:$4 sm:$0xff]   ;;  %v3068_v14 = vld [vmem:[#allocation5 + $0x2c] ss:$16 sps:$4 sm:$0xff]   ;;  %vm3654_vm1 = vmmov 0  }
  0x74   :  { %v3808_v11 = vpack.c.bf16 %v135_v10, %v128_v9  ;;  %v3069_v15 = vld [vmem:[#allocation5 + $0x40] ss:$16 sps:$4 sm:$0xff]   ;;  %v3070_v16 = vld [vmem:[#allocation5 + $0x64] ss:$16 sps:$4 sm:$0xff]   ;;  %v3074_v17 = vld [vmem:[#allocation5 + $0x4c] ss:$16 sps:$4 sm:$0xff]  }
  0x75   :  { %1348 = vmatpush1.bf16.msra.mxu0 %v3063_v8  ;;  %v3075_v18 = vld [vmem:[#allocation5 + $0x60] ss:$16 sps:$4 sm:$0xff]   ;;  %v3072_v19 = vld [vmem:[#allocation5 + $0x48] ss:$16 sps:$4 sm:$0xff]   ;;  %v3076_v20 = vld [vmem:[#allocation5 + $0x84] ss:$16 sps:$4 sm:$0xff]  }
  0x76   :  { %2813 = vmatmul.mubr.msk.bf16.vlgmr.msra.gmra.mrb[0].mxu1 %vm1341_vm0, %v3808_v11  ;;  %1349 = vmatprep.subr.bf16.mxu0 %v3064_v12  ;;  %v3080_v21 = vld [vmem:[#allocation5 + $0x6c] ss:$16 sps:$4 sm:$0xff]   ;;  %v3078_v22 = vld [vmem:[#allocation5 + $0x68] ss:$16 sps:$4 sm:$0xff]   ;;  %v3081_v23 = vld [vmem:[#allocation5 + $0x80] ss:$16 sps:$4 sm:$0xff]  }
  0x77   :  { %1518 = vmatpush1.bf16.msra.mxu1 %v3060_v6  ;;  %v3082_v24 = vld [vmem:[#allocation5 + $0xa4] ss:$16 sps:$4 sm:$0xff]   ;;  %v3086_v25 = vld [vmem:[#allocation5 + $0x8c] ss:$16 sps:$4 sm:$0xff]   ;;  %v3087_v26 = vld [vmem:[#allocation5 + $0xa0] ss:$16 sps:$4 sm:$0xff]  }
  0x78   :  { %1519 = vmatprep.subr.bf16.mxu1 %v3068_v14  ;;  %v3084_v27 = vld [vmem:[#allocation5 + $0x88] ss:$16 sps:$4 sm:$0xff]   ;;  %v3088_v28 = vld [vmem:[#allocation5 + $0xc4] ss:$16 sps:$4 sm:$0xff]   ;;  %v3092_v29 = vld [vmem:[#allocation5 + $0xac] ss:$16 sps:$4 sm:$0xff]  }
  0x79   :  { %1350 = vmatpush1.bf16.msra.mxu0 %v3069_v15  ;;  %v3090_v30 = vld [vmem:[#allocation5 + $0xa8] ss:$16 sps:$4 sm:$0xff]   ;;  %v3093_v31 = vld [vmem:[#allocation5 + $0xc0] ss:$16 sps:$4 sm:$0xff]   ;;  %v3094_v32 = vld [vmem:[#allocation5 + $0xe4] ss:$16 sps:$4 sm:$0xff]  }
  0x7a   :  { %1351 = vmatprep.subr.bf16.mxu0 %v3070_v16  ;;  %v3098_v33 = vld [vmem:[#allocation5 + $0xcc] ss:$16 sps:$4 sm:$0xff]   ;;  %v3099_v34 = vld [vmem:[#allocation5 + $0xe0] ss:$16 sps:$4 sm:$0xff]   ;;  %v3096_v35 = vld [vmem:[#allocation5 + $0xc8] ss:$16 sps:$4 sm:$0xff]  }
  0x7b   :  { %1520 = vmatpush1.bf16.msra.mxu1 %v3066_v13  ;;  %v3100_v36 = vld [vmem:[#allocation5 + $0x104] ss:$16 sps:$4 sm:$0xff]   ;;  %v3104_v37 = vld [vmem:[#allocation5 + $0xec] ss:$16 sps:$4 sm:$0xff]   ;;  %v3102_v38 = vld [vmem:[#allocation5 + $0xe8] ss:$16 sps:$4 sm:$0xff]  }
  0x7c   :  { %1521 = vmatprep.subr.bf16.mxu1 %v3074_v17  ;;  %v3105_v39 = vld [vmem:[#allocation5 + $0x100] ss:$16 sps:$4 sm:$0xff]   ;;  %v3106_v40 = vld [vmem:[#allocation5 + $0x124] ss:$16 sps:$4 sm:$0xff]   ;;  %v3110_v41 = vld [vmem:[#allocation5 + $0x10c] ss:$16 sps:$4 sm:$0xff]  }
  0x7d   :  { %1352 = vmatpush1.bf16.msra.mxu0 %v3075_v18  ;;  %v3111_v42 = vld [vmem:[#allocation5 + $0x120] ss:$16 sps:$4 sm:$0xff]   ;;  %v3108_v43 = vld [vmem:[#allocation5 + $0x108] ss:$16 sps:$4 sm:$0xff]   ;;  %v3112_v44 = vld [vmem:[#allocation5 + $0x144] ss:$16 sps:$4 sm:$0xff]  }
  0x7e   :  { %1353 = vmatprep.subr.bf16.mxu0 %v3076_v20  ;;  %v3116_v45 = vld [vmem:[#allocation5 + $0x12c] ss:$16 sps:$4 sm:$0xff]   ;;  %v3114_v46 = vld [vmem:[#allocation5 + $0x128] ss:$16 sps:$4 sm:$0xff]   ;;  %v3117_v47 = vld [vmem:[#allocation5 + $0x140] ss:$16 sps:$4 sm:$0xff]  }
  0x7f   :  { %1522 = vmatpush1.bf16.msra.mxu1 %v3072_v19  ;;  %v3118_v48 = vld [vmem:[#allocation5 + $0x164] ss:$16 sps:$4 sm:$0xff]   ;;  %v3122_v49 = vld [vmem:[#allocation5 + $0x14c] ss:$16 sps:$4 sm:$0xff]   ;;  %v3120_v50 = vld [vmem:[#allocation5 + $0x148] ss:$16 sps:$4 sm:$0xff]  }
  0x80   :  { %1523 = vmatprep.subr.bf16.mxu1 %v3080_v21  ;;  %v130_v52 = vld [vmem:[#allocation2 + $0x40] sm:$0xff]  ;;  %v3128_v56 = vld [vmem:[#allocation5 + $0x16c] ss:$16 sps:$4 sm:$0xff]   ;;  %v3126_v58 = vld [vmem:[#allocation5 + $0x168] ss:$16 sps:$4 sm:$0xff]   ;;  %s3655_s23 = smov [#allocation13]  }
  0x81   :  { %1354 = vmatpush1.bf16.msra.mxu0 %v3081_v23  ;;  %v3123_v53 = vld [vmem:[#allocation5 + $0x160] ss:$16 sps:$4 sm:$0xff]   ;;  %v137_v54 = vpack.c.bf16 %v130_v52, %v123_v51  ;;  %v3124_v55 = vld [vmem:[#allocation5 + $0x184] ss:$16 sps:$4 sm:$0xff]   ;;  %v3134_v60 = vld [vmem:[#allocation5 + $0x18c] ss:$16 sps:$4 sm:$0xff]  }
  0x82   :  { %1355 = vmatprep.subr.bf16.mxu0 %v3082_v24  ;;  %v3129_v57 = vld [vmem:[#allocation5 + $0x180] ss:$16 sps:$4 sm:$0xff]   ;;  %v3130_v59 = vld [vmem:[#allocation5 + $0x1a4] ss:$16 sps:$4 sm:$0xff]   ;;  %v3132_v62 = vld [vmem:[#allocation5 + $0x188] ss:$16 sps:$4 sm:$0xff]  }
  0x83   :  { %1524 = vmatpush1.bf16.msra.mxu1 %v3078_v22  ;;  %1377 = vmatprep.mubr.bf16.mxu0 %v137_v54  ;;  %v3135_v61 = vld [vmem:[#allocation5 + $0x1a0] ss:$16 sps:$4 sm:$0xff]   ;;  %v3136_v63 = vld [vmem:[#allocation5 + $0x1c4] ss:$16 sps:$4 sm:$0xff]   ;;  %v3140_v1 = vld [vmem:[#allocation5 + $0x1ac] ss:$16 sps:$4 sm:$0xff]  }
  0x84   :  { %1525 = vmatprep.subr.bf16.mxu1 %v3086_v25  ;;  %1549 = vmatprep.mubr.bf16.mxu1 %v137_v54  ;;  %v3141_v2 = vld [vmem:[#allocation5 + $0x1c0] ss:$16 sps:$4 sm:$0xff]   ;;  %v3138_v3 = vld [vmem:[#allocation5 + $0x1a8] ss:$16 sps:$4 sm:$0xff]   ;;  %v3142_v4 = vld [vmem:[#allocation5 + $0x1e4] ss:$16 sps:$4 sm:$0xff]  }
  0x85   :  { %1356 = vmatpush1.bf16.msra.mxu0 %v3087_v26  ;;  %v3146_v5 = vld [vmem:[#allocation5 + $0x1cc] ss:$16 sps:$4 sm:$0xff]   ;;  %v3147_v6 = vld [vmem:[#allocation5 + $0x1e0] ss:$16 sps:$4 sm:$0xff]   ;;  %v3144_v9 = vld [vmem:[#allocation5 + $0x1c8] ss:$16 sps:$4 sm:$0xff]  }
  0x86   :  { %1357 = vmatprep.subr.bf16.mxu0 %v3088_v28  ;;  %v122_v7 = vld [vmem:[#allocation2] sm:$0xff]  ;;  %v129_v8 = vld [vmem:[#allocation2 + $0x38] sm:$0xff]  ;;  %s2602_s24 = sshll.u32 %s3655_s23, 4  ;;  %s2603_s24 = int_to_ptr.vmem [resolvable:$true] %s2602_s24 }
  0x87   :  { %1526 = vmatpush1.bf16.msra.mxu1 %v3084_v27  ;;  %v3150_v10 = vld [vmem:[#allocation5 + $0x204] ss:$16 sps:$4 sm:$0xff]   ;;  %v3153_v12 = vld [vmem:[#allocation5 + $0x1ec] ss:$16 sps:$4 sm:$0xff]   ;;  %v136_v13 = vpack.c.bf16 %v129_v8, %v122_v7  ;;  %v3148_v14 = vld [vmem:[#allocation5 + $0x200] ss:$16 sps:$4 sm:$0xff]   ;;  %p3611_p7 = scmp.lt.s32.totalorder %s2603_s24, %s2603_s24 }
  0x88   :  { %1527 = vmatprep.subr.bf16.mxu1 %v3092_v29  ;;  %v3151_v15 = vld [vmem:[#allocation5 + $0x1e8] ss:$16 sps:$4 sm:$0xff]   ;;  %v3156_v16 = vld [vmem:[#allocation5 + $0x224] ss:$16 sps:$4 sm:$0xff]   ;;  %v3159_v17 = vld [vmem:[#allocation5 + $0x20c] ss:$16 sps:$4 sm:$0xff]  }
  0x89   :  { %1358 = vmatpush1.bf16.msra.mxu0 %v3093_v31  ;;  %v3154_v18 = vld [vmem:[#allocation5 + $0x220] ss:$16 sps:$4 sm:$0xff]   ;;  %v3157_v19 = vld [vmem:[#allocation5 + $0x208] ss:$16 sps:$4 sm:$0xff]   ;;  %v3162_v20 = vld [vmem:[#allocation5 + $0x244] ss:$16 sps:$4 sm:$0xff]  }
  0x8a   :  { %1359 = vmatprep.subr.bf16.mxu0 %v3094_v32  ;;  %v3165_v21 = vld [vmem:[#allocation5 + $0x22c] ss:$16 sps:$4 sm:$0xff]   ;;  %v3160_v22 = vld [vmem:[#allocation5 + $0x240] ss:$16 sps:$4 sm:$0xff]   ;;  %v3163_v23 = vld [vmem:[#allocation5 + $0x228] ss:$16 sps:$4 sm:$0xff]  }
  0x8b   :  { %1528 = vmatpush1.bf16.msra.mxu1 %v3090_v30  ;;  %v3168_v24 = vld [vmem:[#allocation5 + $0x264] ss:$16 sps:$4 sm:$0xff]   ;;  %v3171_v25 = vld [vmem:[#allocation5 + $0x24c] ss:$16 sps:$4 sm:$0xff]   ;;  %v3166_v26 = vld [vmem:[#allocation5 + $0x260] ss:$16 sps:$4 sm:$0xff]  }
  0x8c   :  { %1529 = vmatprep.subr.bf16.mxu1 %v3098_v33  ;;  %v3169_v27 = vld [vmem:[#allocation5 + $0x248] ss:$16 sps:$4 sm:$0xff]   ;;  %v3174_v28 = vld [vmem:[#allocation5 + $0x284] ss:$16 sps:$4 sm:$0xff]   ;;  %v3177_v29 = vld [vmem:[#allocation5 + $0x26c] ss:$16 sps:$4 sm:$0xff]  }
  0x8d   :  { %1360 = vmatpush1.bf16.msra.mxu0 %v3099_v34  ;;  %v3172_v30 = vld [vmem:[#allocation5 + $0x280] ss:$16 sps:$4 sm:$0xff]   ;;  %v3175_v31 = vld [vmem:[#allocation5 + $0x268] ss:$16 sps:$4 sm:$0xff]   ;;  %v3180_v32 = vld [vmem:[#allocation5 + $0x2a4] ss:$16 sps:$4 sm:$0xff]  }
  0x8e   :  { %1361 = vmatprep.subr.bf16.mxu0 %v3100_v36  ;;  %v3183_v33 = vld [vmem:[#allocation5 + $0x28c] ss:$16 sps:$4 sm:$0xff]   ;;  %v3178_v34 = vld [vmem:[#allocation5 + $0x2a0] ss:$16 sps:$4 sm:$0xff]   ;;  %v3186_v36 = vld [vmem:[#allocation5 + $0x2c4] ss:$16 sps:$4 sm:$0xff]  }
  0x8f   :  { %1530 = vmatpush1.bf16.msra.mxu1 %v3096_v35  ;;  %v3181_v35 = vld [vmem:[#allocation5 + $0x288] ss:$16 sps:$4 sm:$0xff]   ;;  %v3204_v51 = vld [vmem:[#allocation5 + $0x324] ss:$16 sps:$4 sm:$0xff]   ;;  %v3207_v52 = vld [vmem:[#allocation5 + $0x30c] ss:$16 sps:$4 sm:$0xff]  }
  0x90   :  { %1531 = vmatprep.subr.bf16.mxu1 %v3104_v37  ;;  %v3189_v37 = vld [vmem:[#allocation5 + $0x2ac] ss:$16 sps:$4 sm:$0xff]   ;;  %v3205_v54 = vld [vmem:[#allocation5 + $0x308] ss:$16 sps:$4 sm:$0xff]   ;;  %v3234_v8 = vld [vmem:[#allocation5 + $0x3c4] ss:$16 sps:$4 sm:$0xff]  }
  0x91   :  { %1362 = vmatpush1.bf16.msra.mxu0 %v3105_v39  ;;  %v125_v39 = vld [vmem:[#allocation2 + $0x18] sm:$0xff] }
  0x92   :  { %1363 = vmatprep.subr.bf16.mxu0 %v3106_v40  ;;  %v132_v40 = vld [vmem:[#allocation2 + $0x50] sm:$0xff]  ;;  %v3229_v7 = vld [vmem:[#allocation5 + $0x388] ss:$16 sps:$4 sm:$0xff]  }
  0x93   :  { %1532 = vmatpush1.bf16.msra.mxu1 %v3102_v38  ;;  %v3184_v38 = vld [vmem:[#allocation5 + $0x2c0] ss:$16 sps:$4 sm:$0xff]  }
  0x94   :  { %1533 = vmatprep.subr.bf16.mxu1 %v3110_v41  ;;  %v3187_v41 = vld [vmem:[#allocation5 + $0x2a8] ss:$16 sps:$4 sm:$0xff]  }
  0x95   :  { %1364 = vmatpush1.bf16.msra.mxu0 %v3111_v42  ;;  %v139_v42 = vpack.c.bf16 %v132_v40, %v125_v39  ;;  %v3270_v39 = vld [vmem:[#allocation5 + $0x484] ss:$16 sps:$4 sm:$0xff]   ;;  %v3273_v40 = vld [vmem:[#allocation5 + $0x46c] ss:$16 sps:$4 sm:$0xff]  }
  0x96   :  { %1365 = vmatprep.subr.bf16.mxu0 %v3112_v44  ;;  %v3195_v44 = vld [vmem:[#allocation5 + $0x2cc] ss:$16 sps:$4 sm:$0xff]  }
  0x97   :  { %1534 = vmatpush1.bf16.msra.mxu1 %v3108_v43  ;;  %v3192_v43 = vld [vmem:[#allocation5 + $0x2e4] ss:$16 sps:$4 sm:$0xff]  }
  0x98   :  { %1535 = vmatprep.subr.bf16.mxu1 %v3116_v45  ;;  %v3190_v45 = vld [vmem:[#allocation5 + $0x2e0] ss:$16 sps:$4 sm:$0xff]  }
  0x99   :  { %1366 = vmatpush1.bf16.msra.mxu0 %v3117_v47  ;;  %v3198_v47 = vld [vmem:[#allocation5 + $0x304] ss:$16 sps:$4 sm:$0xff]  }
  0x9a   :  { %1367 = vmatprep.subr.bf16.mxu0 %v3118_v48  ;;  %v3201_v48 = vld [vmem:[#allocation5 + $0x2ec] ss:$16 sps:$4 sm:$0xff]  }
  0x9b   :  { %1536 = vmatpush1.bf16.msra.mxu1 %v3114_v46  ;;  %v3193_v46 = vld [vmem:[#allocation5 + $0x2c8] ss:$16 sps:$4 sm:$0xff]  }
  0x9c   :  { %1537 = vmatprep.subr.bf16.mxu1 %v3122_v49  ;;  %v3196_v49 = vld [vmem:[#allocation5 + $0x300] ss:$16 sps:$4 sm:$0xff]  }
  0x9d   :  { %1368 = vmatpush1.bf16.msra.mxu0 %v3123_v53  ;;  %v3202_v53 = vld [vmem:[#allocation5 + $0x320] ss:$16 sps:$4 sm:$0xff]  }
  0x9e   :  { %1369 = vmatprep.subr.bf16.mxu0 %v3124_v55  ;;  %v3210_v55 = vld [vmem:[#allocation5 + $0x344] ss:$16 sps:$4 sm:$0xff]  }
  0x9f   :  { %1538 = vmatpush1.bf16.msra.mxu1 %v3120_v50  ;;  %v3199_v50 = vld [vmem:[#allocation5 + $0x2e8] ss:$16 sps:$4 sm:$0xff]  }
  0xa0   :  { %1539 = vmatprep.subr.bf16.mxu1 %v3128_v56  ;;  %v3213_v56 = vld [vmem:[#allocation5 + $0x32c] ss:$16 sps:$4 sm:$0xff]  }
  0xa1   :  { %1370 = vmatpush1.bf16.msra.mxu0 %v3129_v57  ;;  %v3208_v57 = vld [vmem:[#allocation5 + $0x340] ss:$16 sps:$4 sm:$0xff]  }
  0xa2   :  { %1371 = vmatprep.subr.bf16.mxu0 %v3130_v59  ;;  %v3216_v59 = vld [vmem:[#allocation5 + $0x364] ss:$16 sps:$4 sm:$0xff]  }
  0xa3   :  { %1540 = vmatpush1.bf16.msra.mxu1 %v3126_v58  ;;  %v3211_v58 = vld [vmem:[#allocation5 + $0x328] ss:$16 sps:$4 sm:$0xff]  }
  0xa4   :  { %1541 = vmatprep.subr.bf16.mxu1 %v3134_v60  ;;  %v3219_v60 = vld [vmem:[#allocation5 + $0x34c] ss:$16 sps:$4 sm:$0xff]  }
  0xa5   :  { %1372 = vmatpush1.bf16.msra.mxu0 %v3135_v61  ;;  %v3214_v61 = vld [vmem:[#allocation5 + $0x360] ss:$16 sps:$4 sm:$0xff]  }
  0xa6   :  { %1373 = vmatprep.subr.bf16.mxu0 %v3136_v63  ;;  %v3222_v63 = vld [vmem:[#allocation5 + $0x384] ss:$16 sps:$4 sm:$0xff]  }
  0xa7   :  { %1542 = vmatpush1.bf16.msra.mxu1 %v3132_v62  ;;  %v3217_v62 = vld [vmem:[#allocation5 + $0x348] ss:$16 sps:$4 sm:$0xff]  }
  0xa8   :  { %1543 = vmatprep.subr.bf16.mxu1 %v3140_v1  ;;  %v3225_v1 = vld [vmem:[#allocation5 + $0x36c] ss:$16 sps:$4 sm:$0xff]  }
  0xa9   :  { %1374 = vmatpush1.bf16.msra.mxu0 %v3141_v2  ;;  %v3220_v2 = vld [vmem:[#allocation5 + $0x380] ss:$16 sps:$4 sm:$0xff]  }
  0xaa   :  { %1375 = vmatprep.subr.bf16.mxu0 %v3142_v4  ;;  %v3228_v4 = vld [vmem:[#allocation5 + $0x3a4] ss:$16 sps:$4 sm:$0xff]  }
  0xab   :  { %1544 = vmatpush1.bf16.msra.mxu1 %v3138_v3  ;;  %v3223_v3 = vld [vmem:[#allocation5 + $0x368] ss:$16 sps:$4 sm:$0xff]  }
  0xac   :  { %1545 = vmatprep.subr.bf16.mxu1 %v3146_v5  ;;  %v3231_v5 = vld [vmem:[#allocation5 + $0x38c] ss:$16 sps:$4 sm:$0xff]  }
  0xad   :  { %1376 = vmatpush1.bf16.msra.mxu0 %v3147_v6  ;;  %v3226_v6 = vld [vmem:[#allocation5 + $0x3a0] ss:$16 sps:$4 sm:$0xff]  }
  0xae   :  { %1388 = vmatprep.subr.bf16.mxu0 %v3150_v10  ;;  %v3232_v10 = vld [vmem:[#allocation5 + $0x3c0] ss:$16 sps:$4 sm:$0xff]  }
  0xaf   :  { %1546 = vmatpush1.bf16.msra.mxu1 %v3144_v9  ;;  %v3237_v9 = vld [vmem:[#allocation5 + $0x3ac] ss:$16 sps:$4 sm:$0xff]  }
  0xb0   :  { %1547 = vmatprep.subr.bf16.mxu1 %v3153_v12  ;;  %1378 = vmatmul.mubr.bf16.vlgmr.msra.gmra.mrb[0].mxu0 %v136_v13  ;;  %v3235_v12 = vld [vmem:[#allocation5 + $0x3a8] ss:$16 sps:$4 sm:$0xff]  }
  0xb1   :  { %1389 = vmatpush1.bf16.msra.mxu0 %v3148_v14  ;;  %1420 = vmatprep.mubr.bf16.mxu0 %v139_v42  ;;  %v3243_v14 = vld [vmem:[#allocation5 + $0x3cc] ss:$16 sps:$4 sm:$0xff]  }
  0xb2   :  { %1390 = vmatprep.subr.bf16.mxu0 %v3156_v16  ;;  %v124_v16 = vld [vmem:[#allocation2 + $0x10] sm:$0xff] }
  0xb3   :  { %1548 = vmatpush1.bf16.msra.mxu1 %v3151_v15  ;;  %v3238_v15 = vld [vmem:[#allocation5 + $0x3e0] ss:$16 sps:$4 sm:$0xff]  }
  0xb4   :  { %1560 = vmatprep.subr.bf16.mxu1 %v3159_v17  ;;  %v131_v17 = vld [vmem:[#allocation2 + $0x48] sm:$0xff] }
  0xb5   :  { %1391 = vmatpush1.bf16.msra.mxu0 %v3154_v18  ;;  %v3241_v18 = vld [vmem:[#allocation5 + $0x3c8] ss:$16 sps:$4 sm:$0xff]  }
  0xb6   :  { %1550 = vmatmul.mubr.bf16.vlgmr.msra.gmra.mrb[4].mxu1 %v136_v13  ;;  %1392 = vmatprep.subr.bf16.mxu0 %v3162_v20  ;;  %v3240_v13 = vld [vmem:[#allocation5 + $0x3e4] ss:$16 sps:$4 sm:$0xff]   ;;  %v3249_v20 = vld [vmem:[#allocation5 + $0x3ec] ss:$16 sps:$4 sm:$0xff]  }
  0xb7   :  { %1561 = vmatpush1.bf16.msra.mxu1 %v3157_v19  ;;  %1592 = vmatprep.mubr.bf16.mxu1 %v139_v42  ;;  %v3246_v19 = vld [vmem:[#allocation5 + $0x404] ss:$16 sps:$4 sm:$0xff]   ;;  %v3271_v42 = vld [vmem:[#allocation5 + $0x468] ss:$16 sps:$4 sm:$0xff]  }
  0xb8   :  { %1562 = vmatprep.subr.bf16.mxu1 %v3165_v21  ;;  %v138_v21 = vpack.c.bf16 %v131_v17, %v124_v16  ;;  %v3325_v16 = vld [vmem:[#allocation5 + $0x588] ss:$16 sps:$4 sm:$0xff]   ;;  %v3330_v17 = vld [vmem:[#allocation5 + $0x5c4] ss:$16 sps:$4 sm:$0xff]  }
  0xb9   :  { %1393 = vmatpush1.bf16.msra.mxu0 %v3160_v22  ;;  %v3244_v22 = vld [vmem:[#allocation5 + $0x400] ss:$16 sps:$4 sm:$0xff]  }
  0xba   :  { %1394 = vmatprep.subr.bf16.mxu0 %v3168_v24  ;;  %v3252_v24 = vld [vmem:[#allocation5 + $0x424] ss:$16 sps:$4 sm:$0xff]  }
  0xbb   :  { %1563 = vmatpush1.bf16.msra.mxu1 %v3163_v23  ;;  %v3247_v23 = vld [vmem:[#allocation5 + $0x3e8] ss:$16 sps:$4 sm:$0xff]  }
  0xbc   :  { %1564 = vmatprep.subr.bf16.mxu1 %v3171_v25  ;;  %v3255_v25 = vld [vmem:[#allocation5 + $0x40c] ss:$16 sps:$4 sm:$0xff]  }
  0xbd   :  { %1395 = vmatpush1.bf16.msra.mxu0 %v3166_v26  ;;  %v127_v26 = vld [vmem:[#allocation2 + $0x28] sm:$0xff] }
  0xbe   :  { %1396 = vmatprep.subr.bf16.mxu0 %v3174_v28  ;;  %v3250_v28 = vld [vmem:[#allocation5 + $0x420] ss:$16 sps:$4 sm:$0xff]  }
  0xbf   :  { %1565 = vmatpush1.bf16.msra.mxu1 %v3169_v27  ;;  %v134_v27 = vld [vmem:[#allocation2 + $0x60] sm:$0xff] }
  0xc0   :  { %1566 = vmatprep.subr.bf16.mxu1 %v3177_v29  ;;  %v141_v29 = vpack.c.bf16 %v134_v27, %v127_v26  ;;  %v3337_v26 = vld [vmem:[#allocation5 + $0x5c8] ss:$16 sps:$4 sm:$0xff]   ;;  %v3348_v27 = vld [vmem:[#allocation7 + $0x4] ss:$8 sps:$4 sm:$0xff]  }
  0xc1   :  { %1397 = vmatpush1.bf16.msra.mxu0 %v3172_v30  ;;  %v3253_v30 = vld [vmem:[#allocation5 + $0x408] ss:$16 sps:$4 sm:$0xff]  }
  0xc2   :  { %1398 = vmatprep.subr.bf16.mxu0 %v3180_v32  ;;  %v3261_v32 = vld [vmem:[#allocation5 + $0x42c] ss:$16 sps:$4 sm:$0xff]  }
  0xc3   :  { %1567 = vmatpush1.bf16.msra.mxu1 %v3175_v31  ;;  %v3258_v31 = vld [vmem:[#allocation5 + $0x444] ss:$16 sps:$4 sm:$0xff]  }
  0xc4   :  { %1568 = vmatprep.subr.bf16.mxu1 %v3183_v33  ;;  %v3256_v33 = vld [vmem:[#allocation5 + $0x440] ss:$16 sps:$4 sm:$0xff]  }
  0xc5   :  { %1399 = vmatpush1.bf16.msra.mxu0 %v3178_v34  ;;  %v3259_v34 = vld [vmem:[#allocation5 + $0x428] ss:$16 sps:$4 sm:$0xff]  }
  0xc6   :  { %1400 = vmatprep.subr.bf16.mxu0 %v3186_v36  ;;  %v3267_v36 = vld [vmem:[#allocation5 + $0x44c] ss:$16 sps:$4 sm:$0xff]  }
  0xc7   :  { %1569 = vmatpush1.bf16.msra.mxu1 %v3181_v35  ;;  %v3264_v35 = vld [vmem:[#allocation5 + $0x464] ss:$16 sps:$4 sm:$0xff]  }
  0xc8   :  { %1570 = vmatprep.subr.bf16.mxu1 %v3189_v37  ;;  %v3262_v37 = vld [vmem:[#allocation5 + $0x460] ss:$16 sps:$4 sm:$0xff]  }
  0xc9   :  { %1401 = vmatpush1.bf16.msra.mxu0 %v3184_v38  ;;  %v3265_v38 = vld [vmem:[#allocation5 + $0x448] ss:$16 sps:$4 sm:$0xff]  }
  0xca   :  { %1402 = vmatprep.subr.bf16.mxu0 %v3192_v43  ;;  %v3276_v43 = vld [vmem:[#allocation5 + $0x4a4] ss:$16 sps:$4 sm:$0xff]  }
  0xcb   :  { %1571 = vmatpush1.bf16.msra.mxu1 %v3187_v41  ;;  %v3268_v41 = vld [vmem:[#allocation5 + $0x480] ss:$16 sps:$4 sm:$0xff]  }
  0xcc   :  { %1572 = vmatprep.subr.bf16.mxu1 %v3195_v44  ;;  %v3279_v44 = vld [vmem:[#allocation5 + $0x48c] ss:$16 sps:$4 sm:$0xff]  }
  0xcd   :  { %1403 = vmatpush1.bf16.msra.mxu0 %v3190_v45  ;;  %v3274_v45 = vld [vmem:[#allocation5 + $0x4a0] ss:$16 sps:$4 sm:$0xff]  }
  0xce   :  { %1404 = vmatprep.subr.bf16.mxu0 %v3198_v47  ;;  %v3282_v47 = vld [vmem:[#allocation5 + $0x4c4] ss:$16 sps:$4 sm:$0xff]  }
  0xcf   :  { %1573 = vmatpush1.bf16.msra.mxu1 %v3193_v46  ;;  %v3277_v46 = vld [vmem:[#allocation5 + $0x488] ss:$16 sps:$4 sm:$0xff]  }
  0xd0   :  { %1574 = vmatprep.subr.bf16.mxu1 %v3201_v48  ;;  %v3285_v48 = vld [vmem:[#allocation5 + $0x4ac] ss:$16 sps:$4 sm:$0xff]  }
  0xd1   :  { %1405 = vmatpush1.bf16.msra.mxu0 %v3196_v49  ;;  %v3280_v49 = vld [vmem:[#allocation5 + $0x4c0] ss:$16 sps:$4 sm:$0xff]  }
  0xd2   :  { %1406 = vmatprep.subr.bf16.mxu0 %v3204_v51  ;;  %v3288_v51 = vld [vmem:[#allocation5 + $0x4e4] ss:$16 sps:$4 sm:$0xff]  }
  0xd3   :  { %1575 = vmatpush1.bf16.msra.mxu1 %v3199_v50  ;;  %v3283_v50 = vld [vmem:[#allocation5 + $0x4a8] ss:$16 sps:$4 sm:$0xff]  }
  0xd4   :  { %1576 = vmatprep.subr.bf16.mxu1 %v3207_v52  ;;  %v3291_v52 = vld [vmem:[#allocation5 + $0x4cc] ss:$16 sps:$4 sm:$0xff]  }
  0xd5   :  { %1407 = vmatpush1.bf16.msra.mxu0 %v3202_v53  ;;  %v3286_v53 = vld [vmem:[#allocation5 + $0x4e0] ss:$16 sps:$4 sm:$0xff]  }
  0xd6   :  { %1408 = vmatprep.subr.bf16.mxu0 %v3210_v55  ;;  %v3294_v55 = vld [vmem:[#allocation5 + $0x504] ss:$16 sps:$4 sm:$0xff]  }
  0xd7   :  { %1577 = vmatpush1.bf16.msra.mxu1 %v3205_v54  ;;  %v3289_v54 = vld [vmem:[#allocation5 + $0x4c8] ss:$16 sps:$4 sm:$0xff]  }
  0xd8   :  { %1578 = vmatprep.subr.bf16.mxu1 %v3213_v56  ;;  %v3297_v56 = vld [vmem:[#allocation5 + $0x4ec] ss:$16 sps:$4 sm:$0xff]  }
  0xd9   :  { %1409 = vmatpush1.bf16.msra.mxu0 %v3208_v57  ;;  %v3292_v57 = vld [vmem:[#allocation5 + $0x500] ss:$16 sps:$4 sm:$0xff]  }
  0xda   :  { %1410 = vmatprep.subr.bf16.mxu0 %v3216_v59  ;;  %v3300_v59 = vld [vmem:[#allocation5 + $0x524] ss:$16 sps:$4 sm:$0xff]  }
  0xdb   :  { %1579 = vmatpush1.bf16.msra.mxu1 %v3211_v58  ;;  %v3295_v58 = vld [vmem:[#allocation5 + $0x4e8] ss:$16 sps:$4 sm:$0xff]  }
  0xdc   :  { %1580 = vmatprep.subr.bf16.mxu1 %v3219_v60  ;;  %v3303_v60 = vld [vmem:[#allocation5 + $0x50c] ss:$16 sps:$4 sm:$0xff]  }
  0xdd   :  { %1411 = vmatpush1.bf16.msra.mxu0 %v3214_v61  ;;  %v3298_v61 = vld [vmem:[#allocation5 + $0x520] ss:$16 sps:$4 sm:$0xff]  }
  0xde   :  { %1412 = vmatprep.subr.bf16.mxu0 %v3222_v63  ;;  %v3306_v63 = vld [vmem:[#allocation5 + $0x544] ss:$16 sps:$4 sm:$0xff]  }
  0xdf   :  { %1581 = vmatpush1.bf16.msra.mxu1 %v3217_v62  ;;  %v3301_v62 = vld [vmem:[#allocation5 + $0x508] ss:$16 sps:$4 sm:$0xff]  }
  0xe0   :  { %1582 = vmatprep.subr.bf16.mxu1 %v3225_v1  ;;  %v3309_v1 = vld [vmem:[#allocation5 + $0x52c] ss:$16 sps:$4 sm:$0xff]  }
  0xe1   :  { %1413 = vmatpush1.bf16.msra.mxu0 %v3220_v2  ;;  %v3304_v2 = vld [vmem:[#allocation5 + $0x540] ss:$16 sps:$4 sm:$0xff]  }
  0xe2   :  { %1414 = vmatprep.subr.bf16.mxu0 %v3228_v4  ;;  %v3312_v4 = vld [vmem:[#allocation5 + $0x564] ss:$16 sps:$4 sm:$0xff]  }
  0xe3   :  { %1583 = vmatpush1.bf16.msra.mxu1 %v3223_v3  ;;  %v3307_v3 = vld [vmem:[#allocation5 + $0x528] ss:$16 sps:$4 sm:$0xff]  }
  0xe4   :  { %1584 = vmatprep.subr.bf16.mxu1 %v3231_v5  ;;  %v3315_v5 = vld [vmem:[#allocation5 + $0x54c] ss:$16 sps:$4 sm:$0xff]  }
  0xe5   :  { %1415 = vmatpush1.bf16.msra.mxu0 %v3226_v6  ;;  %v3310_v6 = vld [vmem:[#allocation5 + $0x560] ss:$16 sps:$4 sm:$0xff]  }
  0xe6   :  { %1416 = vmatprep.subr.bf16.mxu0 %v3234_v8  ;;  %v3318_v8 = vld [vmem:[#allocation5 + $0x584] ss:$16 sps:$4 sm:$0xff]  }
  0xe7   :  { %1585 = vmatpush1.bf16.msra.mxu1 %v3229_v7  ;;  %v3313_v7 = vld [vmem:[#allocation5 + $0x548] ss:$16 sps:$4 sm:$0xff]  }
  0xe8   :  { %1586 = vmatprep.subr.bf16.mxu1 %v3237_v9  ;;  %v3321_v9 = vld [vmem:[#allocation5 + $0x56c] ss:$16 sps:$4 sm:$0xff]  }
  0xe9   :  { %1417 = vmatpush1.bf16.msra.mxu0 %v3232_v10  ;;  %v3316_v10 = vld [vmem:[#allocation5 + $0x580] ss:$16 sps:$4 sm:$0xff]  }
  0xea   :  { %1418 = vmatprep.subr.bf16.mxu0 %v3240_v13  ;;  %v3324_v13 = vld [vmem:[#allocation5 + $0x5a4] ss:$16 sps:$4 sm:$0xff]  }
  0xeb   :  { %1587 = vmatpush1.bf16.msra.mxu1 %v3235_v12  ;;  %v3319_v12 = vld [vmem:[#allocation5 + $0x568] ss:$16 sps:$4 sm:$0xff]  }
  0xec   :  { %1588 = vmatprep.subr.bf16.mxu1 %v3243_v14  ;;  %v3327_v14 = vld [vmem:[#allocation5 + $0x58c] ss:$16 sps:$4 sm:$0xff]  }
  0xed   :  { %1419 = vmatpush1.bf16.msra.mxu0 %v3238_v15  ;;  %v3322_v15 = vld [vmem:[#allocation5 + $0x5a0] ss:$16 sps:$4 sm:$0xff]  }
  0xee   :  { %1431 = vmatprep.subr.bf16.mxu0 %v3246_v19  ;;  %v3328_v19 = vld [vmem:[#allocation5 + $0x5c0] ss:$16 sps:$4 sm:$0xff]  }
  0xef   :  { %1589 = vmatpush1.bf16.msra.mxu1 %v3241_v18  ;;  %v3333_v18 = vld [vmem:[#allocation5 + $0x5ac] ss:$16 sps:$4 sm:$0xff]  }
  0xf0   :  { %1590 = vmatprep.subr.bf16.mxu1 %v3249_v20  ;;  %1421 = vmatmul.mubr.bf16.vlgmr.msra.gmra.mrb[0].mxu0 %v138_v21  ;;  %v3331_v20 = vld [vmem:[#allocation5 + $0x5a8] ss:$16 sps:$4 sm:$0xff]  }
  0xf1   :  { %1432 = vmatpush1.bf16.msra.mxu0 %v3244_v22  ;;  %1463 = vmatprep.mubr.bf16.mxu0 %v141_v29  ;;  %v3339_v22 = vld [vmem:[#allocation5 + $0x5cc] ss:$16 sps:$4 sm:$0xff]  }
  0xf2   :  { %1433 = vmatprep.subr.bf16.mxu0 %v3252_v24  ;;  %v126_v24 = vld [vmem:[#allocation2 + $0x20] sm:$0xff] }
  0xf3   :  { %1591 = vmatpush1.bf16.msra.mxu1 %v3247_v23  ;;  %v3334_v23 = vld [vmem:[#allocation5 + $0x5e0] ss:$16 sps:$4 sm:$0xff]  }
  0xf4   :  { %1603 = vmatprep.subr.bf16.mxu1 %v3255_v25  ;;  %v133_v25 = vld [vmem:[#allocation2 + $0x58] sm:$0xff] }
  0xf5   :  { %1434 = vmatpush1.bf16.msra.mxu0 %v3250_v28  ;;  %v3342_v28 = vld [vmem:[#allocation5 + $0x5ec] ss:$16 sps:$4 sm:$0xff]  }
  0xf6   :  { %1593 = vmatmul.mubr.bf16.vlgmr.msra.gmra.mrb[4].mxu1 %v138_v21  ;;  %1435 = vmatprep.subr.bf16.mxu0 %v3258_v31  ;;  %v3336_v21 = vld [vmem:[#allocation5 + $0x5e4] ss:$16 sps:$4 sm:$0xff]   ;;  %v3340_v31 = vld [vmem:[#allocation5 + $0x5e8] ss:$16 sps:$4 sm:$0xff]  }
  0xf7   :  { %1604 = vmatpush1.bf16.msra.mxu1 %v3253_v30  ;;  %1635 = vmatprep.mubr.bf16.mxu1 %v141_v29  ;;  %v140_v29 = vpack.c.bf16 %v133_v25, %v126_v24  ;;  %v3346_v30 = vld [vmem:[#allocation7] ss:$8 sps:$4 sm:$0xff]  }
  0xf8   :  { %1605 = vmatprep.subr.bf16.mxu1 %v3261_v32  ;;  %v3351_v32 = vld [vmem:[#allocation7 + $0x14] ss:$8 sps:$4 sm:$0xff]  }
  0xf9   :  { %1436 = vmatpush1.bf16.msra.mxu0 %v3256_v33  ;;  %v3345_v33 = vld [vmem:[#allocation5 + $0x60c] ss:$16 sps:$4 sm:$0xff]  }
  0xfa   :  { %1437 = vmatprep.subr.bf16.mxu0 %v3264_v35  ;;  %v3343_v35 = vld [vmem:[#allocation5 + $0x608] ss:$16 sps:$4 sm:$0xff]  }
  0xfb   :  { %1606 = vmatpush1.bf16.msra.mxu1 %v3259_v34  ;;  %v3349_v34 = vld [vmem:[#allocation7 + $0x10] ss:$8 sps:$4 sm:$0xff]  }
  0xfc   :  { %1607 = vmatprep.subr.bf16.mxu1 %v3267_v36  ;;  %v3354_v36 = vld [vmem:[#allocation7 + $0x24] ss:$8 sps:$4 sm:$0xff]  }
  0xfd   :  { %1438 = vmatpush1.bf16.msra.mxu0 %v3262_v37  ;;  %v3352_v37 = vld [vmem:[#allocation7 + $0x20] ss:$8 sps:$4 sm:$0xff]  }
  0xfe   :  { %1439 = vmatprep.subr.bf16.mxu0 %v3270_v39  ;;  %v3355_v39 = vld [vmem:[#allocation7 + $0x30] ss:$8 sps:$4 sm:$0xff]  }
  0xff   :  { %1608 = vmatpush1.bf16.msra.mxu1 %v3265_v38  ;;  %v3357_v38 = vld [vmem:[#allocation7 + $0x34] ss:$8 sps:$4 sm:$0xff]  }
 0x100   :  { %1609 = vmatprep.subr.bf16.mxu1 %v3273_v40  ;;  %v3360_v40 = vld [vmem:[#allocation7 + $0x44] ss:$8 sps:$4 sm:$0xff]  }
 0x101   :  { %1440 = vmatpush1.bf16.msra.mxu0 %v3268_v41  ;;  %v3358_v41 = vld [vmem:[#allocation7 + $0x40] ss:$8 sps:$4 sm:$0xff]  }
 0x102   :  { %1441 = vmatprep.subr.bf16.mxu0 %v3276_v43  ;;  %v3361_v43 = vld [vmem:[#allocation7 + $0x50] ss:$8 sps:$4 sm:$0xff]  }
 0x103   :  { %1610 = vmatpush1.bf16.msra.mxu1 %v3271_v42  ;;  %v3363_v42 = vld [vmem:[#allocation7 + $0x54] ss:$8 sps:$4 sm:$0xff]  }
 0x104   :  { %1611 = vmatprep.subr.bf16.mxu1 %v3279_v44  ;;  %v3366_v44 = vld [vmem:[#allocation7 + $0x64] ss:$8 sps:$4 sm:$0xff]  }
 0x105   :  { %1442 = vmatpush1.bf16.msra.mxu0 %v3274_v45  ;;  %v3364_v45 = vld [vmem:[#allocation7 + $0x60] ss:$8 sps:$4 sm:$0xff]  }
 0x106   :  { %1443 = vmatprep.subr.bf16.mxu0 %v3282_v47 }
 0x107   :  { %1612 = vmatpush1.bf16.msra.mxu1 %v3277_v46 }
 0x108   :  { %1613 = vmatprep.subr.bf16.mxu1 %v3285_v48  ;;  %v3367_v48 = vld [vmem:[#allocation7 + $0x70] ss:$8 sps:$4 sm:$0xff]  }
 0x109   :  { %1444 = vmatpush1.bf16.msra.mxu0 %v3280_v49 }
 0x10a   :  { %1445 = vmatprep.subr.bf16.mxu0 %v3288_v51 }
 0x10b   :  { %1614 = vmatpush1.bf16.msra.mxu1 %v3283_v50  ;;  %v3372_v50 = vld [vmem:[#allocation7 + $0x84] ss:$8 sps:$4 sm:$0xff]  }
 0x10c   :  { %1615 = vmatprep.subr.bf16.mxu1 %v3291_v52  ;;  %v3375_v52 = vld [vmem:[#allocation7 + $0x94] ss:$8 sps:$4 sm:$0xff]  }
 0x10d   :  { %1446 = vmatpush1.bf16.msra.mxu0 %v3286_v53  ;;  %v3373_v53 = vld [vmem:[#allocation7 + $0x90] ss:$8 sps:$4 sm:$0xff]  }
 0x10e   :  { %1447 = vmatprep.subr.bf16.mxu0 %v3294_v55  ;;  %v3376_v55 = vld [vmem:[#allocation7 + $0xa0] ss:$8 sps:$4 sm:$0xff]  }
 0x10f   :  { %1616 = vmatpush1.bf16.msra.mxu1 %v3289_v54  ;;  %v3378_v54 = vld [vmem:[#allocation7 + $0xa4] ss:$8 sps:$4 sm:$0xff]  }
 0x110   :  { %1617 = vmatprep.subr.bf16.mxu1 %v3297_v56  ;;  %v3381_v56 = vld [vmem:[#allocation7 + $0xb4] ss:$8 sps:$4 sm:$0xff]  }
 0x111   :  { %1448 = vmatpush1.bf16.msra.mxu0 %v3292_v57  ;;  %v3379_v57 = vld [vmem:[#allocation7 + $0xb0] ss:$8 sps:$4 sm:$0xff]  }
 0x112   :  { %1449 = vmatprep.subr.bf16.mxu0 %v3300_v59  ;;  %v3382_v59 = vld [vmem:[#allocation7 + $0xc0] ss:$8 sps:$4 sm:$0xff]  }
 0x113   :  { %1618 = vmatpush1.bf16.msra.mxu1 %v3295_v58  ;;  %v3384_v58 = vld [vmem:[#allocation7 + $0xc4] ss:$8 sps:$4 sm:$0xff]  }
 0x114   :  { %1619 = vmatprep.subr.bf16.mxu1 %v3303_v60  ;;  %v3387_v60 = vld [vmem:[#allocation7 + $0xd4] ss:$8 sps:$4 sm:$0xff]  }
 0x115   :  { %1450 = vmatpush1.bf16.msra.mxu0 %v3298_v61  ;;  %v3385_v61 = vld [vmem:[#allocation7 + $0xd0] ss:$8 sps:$4 sm:$0xff]  }
 0x116   :  { %1451 = vmatprep.subr.bf16.mxu0 %v3306_v63  ;;  %v3388_v63 = vld [vmem:[#allocation7 + $0xe0] ss:$8 sps:$4 sm:$0xff]  }
 0x117   :  { %1620 = vmatpush1.bf16.msra.mxu1 %v3301_v62  ;;  %v3390_v62 = vld [vmem:[#allocation7 + $0xe4] ss:$8 sps:$4 sm:$0xff]  }
 0x118   :  { %1621 = vmatprep.subr.bf16.mxu1 %v3309_v1  ;;  %v3393_v1 = vld [vmem:[#allocation7 + $0xf4] ss:$8 sps:$4 sm:$0xff]  }
 0x119   :  { %1452 = vmatpush1.bf16.msra.mxu0 %v3304_v2  ;;  %v3391_v2 = vld [vmem:[#allocation7 + $0xf0] ss:$8 sps:$4 sm:$0xff]  }
 0x11a   :  { %1453 = vmatprep.subr.bf16.mxu0 %v3312_v4  ;;  %v3442_v4 = vld [vmem:[#allocation8 + $0x40] sm:$0xff]  }
 0x11b   :  { %1622 = vmatpush1.bf16.msra.mxu1 %v3307_v3  ;;  %v3396_v3 = vld [vmem:[#allocation7 + $0x104] ss:$8 sps:$4 sm:$0xff]  }
 0x11c   :  { %1623 = vmatprep.subr.bf16.mxu1 %v3315_v5  ;;  %v3443_v5 = vld [vmem:[#allocation8] sm:$0xff]  }
 0x11d   :  { %1454 = vmatpush1.bf16.msra.mxu0 %v3310_v6  ;;  %v3444_v6 = vld [vmem:[#allocation8 + $0x48] sm:$0xff]  }
 0x11e   :  { %1455 = vmatprep.subr.bf16.mxu0 %v3318_v8  ;;  %v3446_v8 = vld [vmem:[#allocation8 + $0x50] sm:$0xff]  }
 0x11f   :  { %1624 = vmatpush1.bf16.msra.mxu1 %v3313_v7  ;;  %v3445_v7 = vld [vmem:[#allocation8 + $0x8] sm:$0xff]  }
 0x120   :  { %1625 = vmatprep.subr.bf16.mxu1 %v3321_v9  ;;  %v3447_v9 = vld [vmem:[#allocation8 + $0x10] sm:$0xff]  }
 0x121   :  { %1456 = vmatpush1.bf16.msra.mxu0 %v3316_v10  ;;  %v3448_v10 = vld [vmem:[#allocation8 + $0x58] sm:$0xff]  }
 0x122   :  { %1457 = vmatprep.subr.bf16.mxu0 %v3324_v13  ;;  %v3450_v13 = vld [vmem:[#allocation8 + $0x60] sm:$0xff]  }
 0x123   :  { %1626 = vmatpush1.bf16.msra.mxu1 %v3319_v12  ;;  %v3449_v12 = vld [vmem:[#allocation8 + $0x18] sm:$0xff]  }
 0x124   :  { %1627 = vmatprep.subr.bf16.mxu1 %v3327_v14  ;;  %v3451_v14 = vld [vmem:[#allocation8 + $0x20] sm:$0xff]  }
 0x125   :  { %1458 = vmatpush1.bf16.msra.mxu0 %v3322_v15  ;;  %v3452_v15 = vld [vmem:[#allocation8 + $0x68] sm:$0xff]  }
 0x126   :  { %1459 = vmatprep.subr.bf16.mxu0 %v3330_v17 }
 0x127   :  { %1628 = vmatpush1.bf16.msra.mxu1 %v3325_v16  ;;  %v341_v16 = vlaneseq }
 0x128   :  { %1629 = vmatprep.subr.bf16.mxu1 %v3333_v18 }
 0x129   :  { %1460 = vmatpush1.bf16.msra.mxu0 %v3328_v19  ;;  %v3823_v17 = vshrl.u32 %v341_v16, 7  ;;  %v339_v19 = vld [vmem:[%s3893_s2] sm:$0xf]  ;;  %v3429_v16 = vld [vmem:[#allocation7 + $0x1b4] ss:$8 sps:$4 sm:$0xff]  }
 0x12a   :  { %1461 = vmatprep.subr.bf16.mxu0 %v3336_v21 }
 0x12b   :  { %1630 = vmatpush1.bf16.msra.mxu1 %v3331_v20  ;;  %v343_v18 = vsub.s32 0, %v3823_v17  ;;  %v347_v20 = vsub.s32 1, %v3823_v17 }
 0x12c   :  { %1631 = vmatprep.subr.bf16.mxu1 %v3339_v22 }
 0x12d   :  { %1462 = vmatpush1.bf16.msra.mxu0 %v3334_v23  ;;  %v344_v21 = vrot.slane %v339_v19, %v343_v18  ;;  %v348_v22 = vrot.slane %v339_v19, %v347_v20 }
 0x12e   :  { %2097 = vmatprep.subr.bf16.mxu0 %v3348_v27 }
 0x12f   :  { %1632 = vmatpush1.bf16.msra.mxu1 %v3337_v26 }
 0x130   :  { %1633 = vmatprep.subr.bf16.mxu1 %v3342_v28  ;;  %1464 = vmatmul.mubr.bf16.vlgmr.msra.gmra.mrb[0].mxu0 %v140_v29 }
 0x131   :  { %2098 = vmatpush1.bf16.msra.mxu0 %v3346_v30 }
 0x132   :  { %2099 = vmatprep.subr.bf16.mxu0 %v3351_v32 }
 0x133   :  { %1634 = vmatpush1.bf16.msra.mxu1 %v3340_v31 }
 0x134   :  { %1646 = vmatprep.subr.bf16.mxu1 %v3345_v33 }
 0x135   :  { %2100 = vmatpush1.bf16.msra.mxu0 %v3349_v34 }
 0x136   :  { %1636 = vmatmul.mubr.bf16.vlgmr.msra.gmra.mrb[4].mxu1 %v140_v29  ;;  %2101 = vmatprep.subr.bf16.mxu0 %v3354_v36 }
 0x137   :  { %1647 = vmatpush1.bf16.msra.mxu1 %v3343_v35  ;;  %1678 = vmatprep.mubr.bf16.mxu1 %v3652_v0  ;;  %v3369_v0 = vld [vmem:[#allocation7 + $0x74] ss:$8 sps:$4 sm:$0xff]  }
 0x138   :  { %2914 = vmatprep.subr.bf16.mxu1 %v3442_v4  ;;  %v3409_v4 = vld [vmem:[#allocation7 + $0x150] ss:$8 sps:$4 sm:$0xff]  }
 0x139   :  { %2102 = vmatpush1.bf16.msra.mxu0 %v3352_v37 }
 0x13a   :  { %2103 = vmatprep.subr.bf16.mxu0 %v3357_v38 }
 0x13d   :  { %2104 = vmatpush1.bf16.msra.mxu0 %v3355_v39 }
 0x13e   :  { %2105 = vmatprep.subr.bf16.mxu0 %v3360_v40 }
 0x141   :  { %2106 = vmatpush1.bf16.msra.mxu0 %v3358_v41  ;;  %v3394_v41 = vld [vmem:[#allocation7 + $0x100] ss:$8 sps:$4 sm:$0xff]  }
 0x142   :  { %2814 = vmatmul.mubr.msk.bf16.vlgmr.msra.gmra.mrb[4].mxu1 %vm1341_vm0, %v3808_v11  ;;  %2107 = vmatprep.subr.bf16.mxu0 %v3363_v42  ;;  %v3370_v11 = vld [vmem:[#allocation7 + $0x80] ss:$8 sps:$4 sm:$0xff]   ;;  %v351_v42 = vsub.s32 2, %v3823_v17 }
 0x143   :  { %2915 = vmatpush3.bf16.msra.mxu1 %v3443_v5  ;;  %v3414_v5 = vld [vmem:[#allocation7 + $0x164] ss:$8 sps:$4 sm:$0xff]  }
 0x144   :  { %2916 = vmatprep.subr.bf16.mxu1 %v3444_v6  ;;  %v3412_v6 = vld [vmem:[#allocation7 + $0x160] ss:$8 sps:$4 sm:$0xff]  }
 0x145   :  { %2108 = vmatpush1.bf16.msra.mxu0 %v3361_v43  ;;  %v3399_v43 = vld [vmem:[#allocation7 + $0x114] ss:$8 sps:$4 sm:$0xff]  }
 0x146   :  { %2109 = vmatprep.subr.bf16.mxu0 %v3366_v44  ;;  %v355_v44 = vsub.s32 3, %v3823_v17  ;;  %v3459_v17 = vld [vmem:[#allocation10 + $0x8] sm:$0xff]  }
 0x147   :  { %2917 = vmatpush3.bf16.msra.mxu1 %v3445_v7  ;;  %v3417_v7 = vld [vmem:[#allocation7 + $0x174] ss:$8 sps:$4 sm:$0xff]  }
 0x148   :  { %2918 = vmatprep.subr.bf16.mxu1 %v3446_v8  ;;  %v3415_v8 = vld [vmem:[#allocation7 + $0x170] ss:$8 sps:$4 sm:$0xff]  }
 0x149   :  { %v3815_v46 = vpop.f32.mrb[0].mxu1  ;;  %2110 = vmatpush1.bf16.msra.mxu0 %v3364_v45  ;;  %v352_v45 = vrot.slane %v339_v19, %v351_v42 }
 0x14a   :  { %v3817_v47 = vpop.f32.mrb[1].mxu1  ;;  %2111 = vmatprep.subr.bf16.mxu0 %v3369_v0  ;;  %v3397_v0 = vld [vmem:[#allocation7 + $0x110] ss:$8 sps:$4 sm:$0xff]  }
 0x14b   :  { %v3819_v49 = vpop.f32.mrb[2].mxu1  ;;  %2919 = vmatpush3.bf16.msra.mxu1 %v3447_v9  ;;  %v3420_v9 = vld [vmem:[#allocation7 + $0x184] ss:$8 sps:$4 sm:$0xff]  }
 0x14c   :  { %v3821_v51 = vpop.f32.mrb[3].mxu1  ;;  %2920 = vmatprep.subr.bf16.mxu1 %v3448_v10  ;;  %v3418_v10 = vld [vmem:[#allocation7 + $0x180] ss:$8 sps:$4 sm:$0xff]  }
 0x14d   :  { %2112 = vmatpush1.bf16.msra.mxu0 %v3367_v48 }
 0x14e   :  { %2113 = vmatprep.subr.bf16.mxu0 %v3372_v50 }
 0x14f   :  { %2921 = vmatpush3.bf16.msra.mxu1 %v3449_v12  ;;  %v3423_v12 = vld [vmem:[#allocation7 + $0x194] ss:$8 sps:$4 sm:$0xff]  }
 0x150   :  { %2922 = vmatprep.subr.bf16.mxu1 %v3450_v13  ;;  %v3421_v13 = vld [vmem:[#allocation7 + $0x190] ss:$8 sps:$4 sm:$0xff]  }
 0x151   :  { %2114 = vmatpush1.bf16.msra.mxu0 %v3370_v11 }
 0x152   :  { %2115 = vmatprep.subr.bf16.mxu0 %v3375_v52 }
 0x153   :  { %2923 = vmatpush3.bf16.msra.mxu1 %v3451_v14  ;;  %v3426_v14 = vld [vmem:[#allocation7 + $0x1a4] ss:$8 sps:$4 sm:$0xff]  }
 0x154   :  { %2924 = vmatprep.subr.bf16.mxu1 %v3452_v15  ;;  %v3424_v15 = vld [vmem:[#allocation7 + $0x1a0] ss:$8 sps:$4 sm:$0xff]  }
 0x155   :  { %2116 = vmatpush1.bf16.msra.mxu0 %v3373_v53  ;;  %v3405_v53 = vld [vmem:[#allocation7 + $0x134] ss:$8 sps:$4 sm:$0xff]  }
 0x156   :  { %2117 = vmatprep.subr.bf16.mxu0 %v3378_v54 }
 0x159   :  { %2118 = vmatpush1.bf16.msra.mxu0 %v3376_v55 }
 0x15a   :  { %2119 = vmatprep.subr.bf16.mxu0 %v3381_v56 }
 0x15d   :  { %2120 = vmatpush1.bf16.msra.mxu0 %v3379_v57 }
 0x15e   :  { %2121 = vmatprep.subr.bf16.mxu0 %v3384_v58 }
 0x161   :  { %2122 = vmatpush1.bf16.msra.mxu0 %v3382_v59  ;;  %v3403_v59 = vld [vmem:[#allocation7 + $0x130] ss:$8 sps:$4 sm:$0xff]  }
 0x162   :  { %2123 = vmatprep.subr.bf16.mxu0 %v3387_v60 }
 0x165   :  { %2124 = vmatpush1.bf16.msra.mxu0 %v3385_v61 }
 0x166   :  { %2125 = vmatprep.subr.bf16.mxu0 %v3390_v62  ;;  %v3408_v62 = vld [vmem:[#allocation7 + $0x144] ss:$8 sps:$4 sm:$0xff]  }
 0x169   :  { %2126 = vmatpush1.bf16.msra.mxu0 %v3388_v63 }
 0x16a   :  { %2127 = vmatprep.subr.bf16.mxu0 %v3393_v1 }
 0x16d   :  { %2128 = vmatpush1.bf16.msra.mxu0 %v3391_v2  ;;  %v3406_v2 = vld [vmem:[#allocation7 + $0x140] ss:$8 sps:$4 sm:$0xff]  }
 0x16e   :  { %2140 = vmatprep.subr.bf16.mxu0 %v3396_v3  ;;  %v3411_v3 = vld [vmem:[#allocation7 + $0x154] ss:$8 sps:$4 sm:$0xff]  }
 0x203   :  { %v1465_v23 = vpop.f32.mrb[0].mxu0 }
 0x204   :  { %v2994_v24 = vadd.f32 %v1465_v23, %v344_v21  ;;  %v1467_v25 = vpop.f32.mrb[1].mxu0  ;;  %v3435_v23 = vld [vmem:[#allocation7 + $0x1d4] ss:$8 sps:$4 sm:$0xff]  }
 0x205   :  { %v2996_v26 = vadd.f32 %v1467_v25, %v348_v22  ;;  %v1469_v27 = vpop.f32.mrb[2].mxu0  ;;  %v3438_v25 = vld [vmem:[#allocation7 + $0x1e4] ss:$8 sps:$4 sm:$0xff]  }
 0x206   :  { %v2995_v28 = vadd.f32 %v2994_v24, %v3815_v46  ;;  %v2998_v29 = vadd.f32 %v1469_v27, %v344_v21  ;;  %v1471_v30 = vpop.f32.mrb[3].mxu0  ;;  %v356_v46 = vrot.slane %v339_v19, %v355_v44  ;;  %v3427_v19 = vld [vmem:[#allocation7 + $0x1b0] ss:$8 sps:$4 sm:$0xff]   ;;  %v3432_v21 = vld [vmem:[#allocation7 + $0x1c4] ss:$8 sps:$4 sm:$0xff]  }
 0x207   :  { %v2997_v31 = vadd.f32 %v2996_v26, %v3817_v47  ;;  %v3000_v32 = vadd.f32 %v1471_v30, %v348_v22  ;;  %v3402_v47 = vld [vmem:[#allocation7 + $0x124] ss:$8 sps:$4 sm:$0xff]   ;;  %v3430_v22 = vld [vmem:[#allocation7 + $0x1c0] ss:$8 sps:$4 sm:$0xff]   ;;  %v3433_v24 = vld [vmem:[#allocation7 + $0x1d0] ss:$8 sps:$4 sm:$0xff]  }
 0x208   :  { %v2999_v33 = vadd.f32 %v2998_v29, %v3819_v49  ;;  %v1689_v35 = vmax.f32 %v2995_v28, 0.0  ;;  %v3436_v26 = vld [vmem:[#allocation7 + $0x1e0] ss:$8 sps:$4 sm:$0xff]   ;;  %v3441_v27 = vld [vmem:[#allocation7 + $0x1f4] ss:$8 sps:$4 sm:$0xff]  }
 0x209   :  { %v3001_v34 = vadd.f32 %v3000_v32, %v3821_v51  ;;  %v1690_v37 = vmax.f32 %v2997_v31, 0.0  ;;  %v3400_v51 = vld [vmem:[#allocation7 + $0x120] ss:$8 sps:$4 sm:$0xff]   ;;  %v3439_v28 = vld [vmem:[#allocation7 + $0x1f0] ss:$8 sps:$4 sm:$0xff]  }
 0x20a   :  { %v1693_v36 = vmax.f32 %v2999_v33, 0.0  ;;  %v3453_v29 = vld [vmem:[#allocation8 + $0x28] sm:$0xff]   ;;  %v3454_v30 = vld [vmem:[#allocation8 + $0x70] sm:$0xff]   ;;  %v3456_v32 = vld [vmem:[#allocation8 + $0x78] sm:$0xff]  }
 0x20b   :  { %v1694_v38 = vmax.f32 %v3001_v34, 0.0  ;;  %2925 = vmatpush3.bf16.msra.mxu1 %v3453_v29  ;;  %v3455_v31 = vld [vmem:[#allocation8 + $0x30] sm:$0xff]   ;;  %v3457_v33 = vld [vmem:[#allocation8 + $0x38] sm:$0xff]   ;;  %v3653_v34 = vmov 0.0  }
 0x20c   :  { %v1697_v39 = vpack.c.bf16 %v1693_v36, %v1689_v35  ;;  %2926 = vmatprep.subr.bf16.mxu1 %v3454_v30  ;;  %v1765_v35 = vld [vmem:[%s3895_s4] sm:$0x3] }
 0x20d   :  { %v1698_v40 = vpack.c.bf16 %v1694_v38, %v1690_v37  ;;  %v1770_v36 = vrot.slane %v1765_v35, %v343_v18  ;;  %v1774_v37 = vrot.slane %v1765_v35, %v347_v20  ;;  %v3460_v18 = vld [vmem:[#allocation10 + $0x10] sm:$0xff]   ;;  %v3461_v20 = vld [vmem:[#allocation10 + $0x18] sm:$0xff]  }
 0x20f   :  { %2129 = vmatprep.mubr.bf16.mxu0 %v1698_v40  ;;  %2927 = vmatpush3.bf16.msra.mxu1 %v3455_v31 }
 0x210   :  { %2130 = vmatmul.mubr.bf16.vlgmr.msra.gmra.mrb[4].mxu0 %v1697_v39  ;;  %2928 = vmatprep.subr.bf16.mxu1 %v3456_v32 }
 0x211   :  { %2141 = vmatpush1.bf16.msra.mxu0 %v3394_v41 }
 0x212   :  { %2142 = vmatprep.subr.bf16.mxu0 %v3399_v43 }
 0x213   :  { %2929 = vmatpush3.bf16.msra.mxu1 %v3457_v33 }
 0x214   :  { %2954 = vmatprep.subr.bf16.mxu1 %v3653_v34 }
 0x215   :  { %v1680_v48 = vpop.f32.mrb[4].mxu1  ;;  %2143 = vmatpush1.bf16.msra.mxu0 %v3397_v0 }
 0x216   :  { %v3002_v49 = vadd.f32 %v1680_v48, %v352_v45  ;;  %v1682_v50 = vpop.f32.mrb[5].mxu1  ;;  %2144 = vmatprep.subr.bf16.mxu0 %v3402_v47 }
 0x217   :  { %v3003_v11 = vadd.f32 %v1682_v50, %v356_v46  ;;  %v1684_v52 = vpop.f32.mrb[6].mxu1 }
 0x218   :  { %v3004_v54 = vadd.f32 %v1684_v52, %v352_v45  ;;  %v1686_v55 = vpop.f32.mrb[7].mxu1  ;;  %v1691_v57 = vmax.f32 %v3002_v49, 0.0  ;;  %v3463_v52 = vld [vmem:[#allocation10 + $0x28] sm:$0xff]  }
 0x219   :  { %v3005_v56 = vadd.f32 %v1686_v55, %v356_v46  ;;  %2145 = vmatpush1.bf16.msra.mxu0 %v3400_v51  ;;  %v1692_v60 = vmax.f32 %v3003_v11, 0.0  ;;  %v3458_v51 = vld [vmem:[#allocation10] sm:$0xff]  }
 0x21a   :  { %v1695_v58 = vmax.f32 %v3004_v54, 0.0  ;;  %2146 = vmatprep.subr.bf16.mxu0 %v3405_v53  ;;  %v3462_v11 = vld [vmem:[#allocation10 + $0x20] sm:$0xff]   ;;  %v3464_v53 = vld [vmem:[#allocation10 + $0x30] sm:$0xff]   ;;  %v3465_v54 = vld [vmem:[#allocation10 + $0x38] sm:$0xff]  }
 0x21b   :  { %v1696_v61 = vmax.f32 %v3005_v56, 0.0  ;;  %v2879_v56 = vld [vmem:[%s3897_s6] ss:$0 sm:$0xff] }
 0x21c   :  { %v1699_v63 = vpack.c.bf16 %v1695_v58, %v1691_v57 }
 0x21d   :  { %v1700_v1 = vpack.c.bf16 %v1696_v61, %v1692_v60  ;;  %2147 = vmatpush1.bf16.msra.mxu0 %v3403_v59 }
 0x21e   :  { %2148 = vmatprep.subr.bf16.mxu0 %v3408_v62 }
 0x21f   :  { %2172 = vmatprep.mubr.bf16.mxu0 %v1700_v1 }
 0x221   :  { %2149 = vmatpush1.bf16.msra.mxu0 %v3406_v2 }
 0x222   :  { %2150 = vmatprep.subr.bf16.mxu0 %v3411_v3  ;;  %v3466_v3 = vld [vmem:[#allocation11] sm:$0xff]  }
 0x225   :  { %2151 = vmatpush1.bf16.msra.mxu0 %v3409_v4 }
 0x226   :  { %2152 = vmatprep.subr.bf16.mxu0 %v3414_v5  ;;  %v3467_v5 = vld [vmem:[#allocation11 + $0x8] sm:$0xff]  }
 0x229   :  { %2153 = vmatpush1.bf16.msra.mxu0 %v3412_v6  ;;  %v3468_v6 = vld [vmem:[#allocation11 + $0x10] sm:$0xff]  }
 0x22a   :  { %2154 = vmatprep.subr.bf16.mxu0 %v3417_v7  ;;  %v3469_v7 = vld [vmem:[#allocation11 + $0x18] sm:$0xff]  }
 0x22d   :  { %2155 = vmatpush1.bf16.msra.mxu0 %v3415_v8  ;;  %v3470_v8 = vld [vmem:[#allocation11 + $0x20] sm:$0xff]  }
 0x22e   :  { %2156 = vmatprep.subr.bf16.mxu0 %v3420_v9  ;;  %v3471_v9 = vld [vmem:[#allocation11 + $0x28] sm:$0xff]  }
 0x231   :  { %2157 = vmatpush1.bf16.msra.mxu0 %v3418_v10  ;;  %v3472_v10 = vld [vmem:[#allocation11 + $0x30] sm:$0xff]  }
 0x232   :  { %2158 = vmatprep.subr.bf16.mxu0 %v3423_v12  ;;  %v3473_v12 = vld [vmem:[#allocation11 + $0x38] sm:$0xff]  }
 0x235   :  { %2159 = vmatpush1.bf16.msra.mxu0 %v3421_v13  ;;  %v2896_v13 = vld [vmem:[%s3899_s8] ss:$0 sm:$0xff]  ;;  %s3606_s8 = scalar_lea.vmem %s2603_s24, 256 }
 0x236   :  { %2160 = vmatprep.subr.bf16.mxu0 %v3426_v14  ;;  %p3607_p6 = scmp.ne.s32.totalorder %s2603_s24, %s3606_s8  ;;  %p3612_p8 = scmp.lt.s32.totalorder %s3606_s8, %s3606_s8 }
 0x238   :  { %p3613_p9 = por %p3612_p8, %p3611_p7 }
 0x239   :  { %2161 = vmatpush1.bf16.msra.mxu0 %v3424_v15 }
 0x23a   :  { %2162 = vmatprep.subr.bf16.mxu0 %v3429_v16  ;;  %p3614_p10 = pnand %p3613_p9, %p3607_p6 }
 0x23d   :  { %2163 = vmatpush1.bf16.msra.mxu0 %v3427_v19 }
 0x23e   :  { %2164 = vmatprep.subr.bf16.mxu0 %v3432_v21 }
 0x241   :  { %2165 = vmatpush1.bf16.msra.mxu0 %v3430_v22 }
 0x242   :  { %2166 = vmatprep.subr.bf16.mxu0 %v3435_v23 }
 0x245   :  { %2167 = vmatpush1.bf16.msra.mxu0 %v3433_v24 }
 0x246   :  { %2168 = vmatprep.subr.bf16.mxu0 %v3438_v25 }
 0x249   :  { %2169 = vmatpush1.bf16.msra.mxu0 %v3436_v26  ;;  %v2905_v26 = vld [vmem:[%s3901_s10] ss:$0 sm:$0xff] }
 0x24a   :  { %2170 = vmatprep.subr.bf16.mxu0 %v3441_v27 }
 0x24d   :  { %2171 = vmatpush1.bf16.msra.mxu0 %v3439_v28 }
 0x250   :  { %2173 = vmatmul.mubr.bf16.vlgmr.msra.gmra.mrb[4].mxu0 %v1699_v63 }
 0x323   :  { %v2174_v38 = vpop.f32.mrb[4].mxu0 }
 0x324   :  { %v3006_v39 = vadd.f32 %v2174_v38, %v1770_v36  ;;  %v2176_v40 = vpop.f32.mrb[5].mxu0 }
 0x325   :  { %v3007_v41 = vadd.f32 %v2176_v40, %v1774_v37  ;;  %v2178_v42 = vpop.f32.mrb[6].mxu0 }
 0x326   :  { %v3008_v43 = vadd.f32 %v2178_v42, %v1770_v36  ;;  %v2180_v44 = vpop.f32.mrb[7].mxu0  ;;  %v2183_v0 = vmax.f32 %v3006_v39, 0.0 }
 0x327   :  { %v3009_v45 = vadd.f32 %v2180_v44, %v1774_v37  ;;  %v2184_v47 = vmax.f32 %v3007_v41, 0.0 }
 0x328   :  { %v2185_v46 = vmax.f32 %v3008_v43, 0.0 }
 0x329   :  { %v2186_v48 = vmax.f32 %v3009_v45, 0.0 }
 0x32a   :  { %v2187_v49 = vpack.c.bf16 %v2185_v46, %v2183_v0 }
 0x32b   :  { %v2188_v50 = vpack.c.bf16 %v2186_v48, %v2184_v47 }
 0x32d   :  { %2356 = vmatprep.mubr.bf16.mxu1 %v2188_v50 }
 0x32e   :  { %2357 = vmatmul.mubr.bf16.vlgmr.msra.gmra.mrb[8].mxu1 %v2187_v49 }
 0x32f   :  { %2955 = vmatpush3.bf16.msra.mxu1 %v3458_v51  ;;  %2970 = vmatprep.mubr.msk.bf16.mxu1 %vm3654_vm1, %v3653_v34 }
 0x330   :  { %2956 = vmatprep.subr.bf16.mxu1 %v3653_v34 }
 0x333   :  { %2957 = vmatpush3.bf16.msra.mxu1 %v3459_v17 }
 0x334   :  { %2958 = vmatprep.subr.bf16.mxu1 %v3653_v34 }
 0x337   :  { %2959 = vmatpush3.bf16.msra.mxu1 %v3460_v18 }
 0x338   :  { %2960 = vmatprep.subr.bf16.mxu1 %v3653_v34 }
 0x33b   :  { %2961 = vmatpush3.bf16.msra.mxu1 %v3461_v20 }
 0x33c   :  { %2962 = vmatprep.subr.bf16.mxu1 %v3653_v34 }
 0x33f   :  { %2963 = vmatpush3.bf16.msra.mxu1 %v3462_v11 }
 0x340   :  { %2964 = vmatprep.subr.bf16.mxu1 %v3653_v34 }
 0x343   :  { %2965 = vmatpush3.bf16.msra.mxu1 %v3463_v52 }
 0x344   :  { %2966 = vmatprep.subr.bf16.mxu1 %v3653_v34 }
 0x347   :  { %2967 = vmatpush3.bf16.msra.mxu1 %v3464_v53 }
 0x348   :  { %2968 = vmatprep.subr.bf16.mxu1 %v3653_v34 }
 0x34b   :  { %2969 = vmatpush3.bf16.msra.mxu1 %v3465_v54 }
 0x34c   :  { %2974 = vmatprep.subr.bf16.mxu1 %v3653_v34 }
 0x401   :  { %v2930_v55 = vpop.f32.mrb[8].mxu1 }
 0x402   :  { %v2931_v57 = vpop.f32.mrb[9].mxu1 }
 0x403   :  { %v2932_v58 = vadd.f32 %v2931_v57, %v2930_v55  ;;  %v2933_v59 = vpop.f32.mrb[10].mxu1 }
 0x404   :  { %v2934_v60 = vpop.f32.mrb[11].mxu1 }
 0x405   :  { %v2359_v61 = vadd.f32 %v2932_v58, %v2879_v56  ;;  %v2935_v62 = vadd.f32 %v2934_v60, %v2933_v59 }
 0x407   :  { %v2362_v63 = vadd.f32 %v2935_v62, %v2879_v56  ;;  %v2365_v1 = vmax.f32 %v2359_v61, 0.0 }
 0x409   :  { %v2366_v2 = vmax.f32 %v2362_v63, 0.0 }
 0x40b   :  { %v2367_v4 = vpack.c.bf16 %v2366_v2, %v2365_v1 }
 0x40d   :  { %2971 = vmatmul.mubr.bf16.vlgmr.msra.gmra.mrb[12].mxu1 %v2367_v4 }
 0x40e   :  { %2975 = vmatpush3.bf16.msra.mxu1 %v3466_v3  ;;  %2990 = vmatprep.mubr.msk.bf16.mxu1 %vm3654_vm1, %v3653_v34 }
 0x40f   :  { %2976 = vmatprep.subr.bf16.mxu1 %v3653_v34 }
 0x412   :  { %2977 = vmatpush3.bf16.msra.mxu1 %v3467_v5 }
 0x413   :  { %2978 = vmatprep.subr.bf16.mxu1 %v3653_v34 }
 0x416   :  { %2979 = vmatpush3.bf16.msra.mxu1 %v3468_v6 }
 0x417   :  { %2980 = vmatprep.subr.bf16.mxu1 %v3653_v34 }
 0x41a   :  { %2981 = vmatpush3.bf16.msra.mxu1 %v3469_v7 }
 0x41b   :  { %2982 = vmatprep.subr.bf16.mxu1 %v3653_v34 }
 0x41e   :  { %2983 = vmatpush3.bf16.msra.mxu1 %v3470_v8 }
 0x41f   :  { %2984 = vmatprep.subr.bf16.mxu1 %v3653_v34 }
 0x422   :  { %2985 = vmatpush3.bf16.msra.mxu1 %v3471_v9 }
 0x423   :  { %2986 = vmatprep.subr.bf16.mxu1 %v3653_v34 }
 0x426   :  { %2987 = vmatpush3.bf16.msra.mxu1 %v3472_v10 }
 0x427   :  { %2988 = vmatprep.subr.bf16.mxu1 %v3653_v34 }
 0x42a   :  { %2989 = vmatpush3.bf16.msra.mxu1 %v3473_v12 }
 0x4e0   :  { %v2473_v14 = vpop.f32.mrb[12].mxu1 }
 0x4e1   :  { %v2474_v15 = vadd.f32 %v2896_v13, %v2473_v14  ;;  %v2972_v16 = vpop.f32.mrb[13].mxu1 }
 0x4e2   :  { %v2476_v19 = vpop.f32.mrb[14].mxu1 }
 0x4e3   :  { %v2477_v21 = vadd.f32 %v2896_v13, %v2476_v19  ;;  %v2973_v22 = vpop.f32.mrb[15].mxu1  ;;  %v2480_v23 = vmax.f32 %v2474_v15, 0.0 }
 0x4e5   :  { %v2481_v24 = vmax.f32 %v2477_v21, 0.0 }
 0x4e7   :  { %v2482_v25 = vpack.c.bf16 %v2481_v24, %v2480_v23 }
 0x4e9   :  { %2991 = vmatmul.mubr.bf16.vlgmr.msra.gmra.mrb[16].mxu1 %v2482_v25 }
 0x5bc   :  { %v2588_v27 = vpop.f32.mrb[16].mxu1 }
 0x5bd   :  { %v2589_v28 = vadd.f32 %v2905_v26, %v2588_v27  ;;  %v2992_v29 = vpop.f32.mrb[17].mxu1 }
 0x5be   :  { %v2591_v30 = vpop.f32.mrb[18].mxu1 }
 0x5bf   :  { %2595 = vst [vmem:[#allocation13] sm:$0xff] %v2589_v28  ;;  %v2592_v31 = vadd.f32 %v2905_v26, %v2591_v30  ;;  %v2993_v32 = vpop.f32.mrb[19].mxu1 }
 0x5c1   :  { %2596 = vst [vmem:[#allocation13 + $0x8] sm:$0xff] %v2592_v31 }
 0x5c2   :  { %3617 = shalt.err (!%p3614_p10)
}
 0x5c3   :  { %s3618_s3 = scalar_lea.hbm %s3902_s11, 256 }
 0x5c4   :  { %p3619_p11 = scmp.ne.s32.totalorder %s3902_s11, %s3618_s3  ;;  %p3622_p12 = scmp.lt.u32.totalorder %s3618_s3, %s3902_s11 }
 0x5c6   :  { %p3624_p13 = pnand %p3622_p12, %p3619_p11 }
 0x5c8   :  { %3627 = shalt.err (!%p3624_p13)
}
 0x5c9   :  { %2608 = dma.vmem_to_hbm [thread:$0]  %s2603_s24, 256, %s3902_s11, [#allocation4], %s3648_s0, %s3648_s0, %s3649_s26  }
 0x5ca   :  { %3636 = dma.done.wait [#allocation4], 256  }
 0x5cb   :  { %3637 = vsyncadd [#allocation4], 4294967040 }
 0x5cc   :  { %2612 = vsyncpa [#allocation3], 1 }
 0x5cd   :  { %2613 = vsyncpa [#allocation6], 1 }
 0x5ce   :  { %2614 = vsyncpa [#allocation9], 1 }
 0x5cf   :  { %2615 = vsyncpa [#allocation12], 1 }
 0x5d0   :  { %2616 = vsyncpa [#allocation4], 1 }

</bundles_post_ra>
